<compile_context>
chip_gen: v7x
topology: tpu7x:2x2x1
jax: 0.10.0
libtpu: 0.0.40
codegen_flags: <defaults>
</compile_context>

<pallas_src>
import jax
import jax.numpy as jnp
from jax.experimental import pallas as pl
from jax.experimental.pallas import tpu as pltpu

HIDDEN = 256


def critic_kernel(xt_ref, at_ref,
                  w1x_ref, w1a_ref, b1_ref,     # (512, latent), (512, action), (512, 1)
                  w2a_ref, b2a_ref,             # head-1 layer 2: (256, 256), (256, 1)
                  w2b_ref, b2b_ref,             # head-2 layer 2: (256, 256), (256, 1)
                  w3a_ref, w3b_ref, b3_ref,     # (1, 256), (1, 256), (2, 1)
                  q_ref):                       # output tile: (2, TB), lane-dense
    # Layer 1, both heads fused on the feature (sublane) axis.  Split W1
    # folds the cat([x, a]) into two matmuls (extra K=action pass is cheap).
    z1 = jnp.dot(w1x_ref[...], xt_ref[...], preferred_element_type=jnp.float32)
    z1 = z1 + jnp.dot(w1a_ref[...], at_ref[...], preferred_element_type=jnp.float32)
    h1 = jnp.maximum(z1 + b1_ref[...], 0.0)                 # (512, TB)
    h1a = h1[:HIDDEN, :]                                     # free sublane views
    h1b = h1[HIDDEN:, :]

    # Layer 2: both heads' MXU matmuls back-to-back, then VPU bias + ReLU.
    z2a = jnp.dot(w2a_ref[...], h1a, preferred_element_type=jnp.float32)
    z2b = jnp.dot(w2b_ref[...], h1b, preferred_element_type=jnp.float32)
    h2a = jnp.maximum(z2a + b2a_ref[...], 0.0)               # (256, TB)
    h2b = jnp.maximum(z2b + b2b_ref[...], 0.0)

    # Layer 3: per-head (1,256)@(256,TB) -> dense (1,TB) rows.  No (TB,512)
    # concat of h2 and no block-diagonal zero-padded W3.
    qa = jnp.dot(w3a_ref[...], h2a, preferred_element_type=jnp.float32)
    qb = jnp.dot(w3b_ref[...], h2b, preferred_element_type=jnp.float32)
    q = jnp.concatenate([qa, qb], axis=0) + b3_ref[...]      # (2, TB)
    q_ref[...] = q.astype(q_ref.dtype)


def _round_up(n, m):
    return ((n + m - 1) // m) * m


def _pick_batch_tile(b128):
    """b128 = batch rounded up to a multiple of 128 (one lane width)."""
    if b128 <= 256:
        return b128                      # tiny batch: a single grid step
    # Large tiles to amortize per-step overhead, but keep >= 2 grid steps so
    # the 'parallel' batch axis can shard across v7x's two TensorCores.
    for tb in (1024, 512, 256):
        if b128 % tb == 0 and b128 // tb >= 2:
            return tb
    return 256


def prepare_kernel_params(params, latent_dims):
    """One-time weight prep (fuse + transpose) into feature-major layout.

    Done at parameter-creation/update time so the per-step jitted forward
    contains only the pallas_call (no weight concats/transposes per call).
    """
    p1, p2 = params["q1"], params["q2"]
    w1t = jnp.concatenate([p1["w1"].T, p2["w1"].T], axis=0)        # (512, Din)
    b1t = jnp.concatenate([p1["b1"].T, p2["b1"].T], axis=0)        # (512, 1)
    return {
        "w1x": w1t[:, :latent_dims],                               # (512, latent)
        "w1a": w1t[:, latent_dims:],                               # (512, action)
        "b1": b1t,
        "w2a": p1["w2"].T, "b2a": p1["b2"].T,                      # (256, 256), (256, 1)
        "w2b": p2["w2"].T, "b2b": p2["b2"].T,
        "w3a": p1["w3"].T, "w3b": p2["w3"].T,                      # (1, 256) each
        "b3": jnp.concatenate([p1["b3"].T, p2["b3"].T], axis=0),   # (2, 1)
    }


def critic_forward(x, a, kp):
    """Pallas-backed Critic forward.  kp = prepare_kernel_params(params, latent).

    Returns (q1, q2), each of shape (B, 1)."""
    B, latent = x.shape
    action = a.shape[1]

    b128 = _round_up(B, 128)
    tb = _pick_batch_tile(b128)
    padded_b = _round_up(b128, tb)
    grid = (padded_b // tb,)

    # Feature-major inputs: batch on the lane axis.  Two tiny transposes of
    # (B, feat) arrays replace the cat([x, a], -1) HBM round trip.
    xt = x.T
    at = a.T
    if padded_b != B:
        xt = jnp.pad(xt, ((0, 0), (0, padded_b - B)))
        at = jnp.pad(at, ((0, 0), (0, padded_b - B)))

    def resident(arr):
        # Constant block index -> fetched once, stays VMEM-resident across steps.
        return pl.BlockSpec(arr.shape, lambda i: (0, 0))

    q = pl.pallas_call(
        critic_kernel,
        out_shape=jax.ShapeDtypeStruct((2, padded_b), jnp.float32),
        grid=grid,
        in_specs=[
            pl.BlockSpec((latent, tb), lambda i: (0, i)),   # x^T batch tile
            pl.BlockSpec((action, tb), lambda i: (0, i)),   # a^T batch tile
            resident(kp["w1x"]), resident(kp["w1a"]), resident(kp["b1"]),
            resident(kp["w2a"]), resident(kp["b2a"]),
            resident(kp["w2b"]), resident(kp["b2b"]),
            resident(kp["w3a"]), resident(kp["w3b"]), resident(kp["b3"]),
        ],
        out_specs=pl.BlockSpec((2, tb), lambda i: (0, i)),  # lane-dense output
        compiler_params=pltpu.CompilerParams(
            dimension_semantics=("parallel",)),
    )(xt, at,
      kp["w1x"], kp["w1a"], kp["b1"],
      kp["w2a"], kp["b2a"], kp["w2b"], kp["b2b"],
      kp["w3a"], kp["w3b"], kp["b3"])

    q1 = q[0, :B].reshape(B, 1)
    q2 = q[1, :B].reshape(B, 1)
    return q1, q2


def init_params(key, latent_dims, action_shape, hidden=HIDDEN):
    """Deterministic synthetic init (stand-in for weight_init in rpc.py)."""
    din = latent_dims + action_shape

    def linear(k, fan_in, fan_out):
        kw, kb = jax.random.split(k)
        scale = 1.0 / jnp.sqrt(jnp.float32(fan_in))
        w = jax.random.uniform(kw, (fan_in, fan_out), jnp.float32, -scale, scale)
        b = jax.random.uniform(kb, (1, fan_out), jnp.float32, -scale, scale)
        return w, b

    keys = jax.random.split(key, 6)

    def head(ks):
        w1, b1 = linear(ks[0], din, hidden)
        w2, b2 = linear(ks[1], hidden, hidden)
        w3, b3 = linear(ks[2], hidden, 1)
        return {"w1": w1, "b1": b1, "w2": w2, "b2": b2, "w3": w3, "b3": b3}

    return {"q1": head(keys[0:3]), "q2": head(keys[3:6])}


def reference_forward(x, a, params):
    """Accurate (HIGHEST-precision) JAX reference of the PyTorch module."""
    xa = jnp.concatenate([x, a], axis=-1)
    hp = jax.lax.Precision.HIGHEST

    def mlp(p):
        h1 = jnp.maximum(jnp.dot(xa, p["w1"], precision=hp) + p["b1"], 0.0)
        h2 = jnp.maximum(jnp.dot(h1, p["w2"], precision=hp) + p["b2"], 0.0)
        return jnp.dot(h2, p["w3"], precision=hp) + p["b3"]

    return mlp(params["q1"]), mlp(params["q2"])


if __name__ == "__main__":
    latent_dims = 32
    action_shape = 8
    batch = 8

    key = jax.random.PRNGKey(0)
    k_params, k_x, k_a = jax.random.split(key, 3)

    params = init_params(k_params, latent_dims, action_shape)
    kparams = prepare_kernel_params(params, latent_dims)   # one-time weight prep

    x = jax.random.normal(k_x, (batch, latent_dims), jnp.float32)
    a = jax.random.normal(k_a, (batch, action_shape), jnp.float32)

    q1, q2 = jax.jit(critic_forward)(x, a, kparams)
    jax.block_until_ready((q1, q2))

    r1, r2 = reference_forward(x, a, params)
    assert q1.shape == (batch, 1) and q2.shape == (batch, 1)
    # With Mosaic's f32 MXU path the observed error is ~1e-6; the tolerance is
    # sized so the check also covers a single-pass-bf16 f32-matmul compiler
    # default (worst case ~5e-3 at these magnitudes) and never flakes across
    # TPU generations, while still catching any wiring/layout error (O(1)).
    assert jnp.allclose(q1, r1, atol=1e-2, rtol=1e-2)
    assert jnp.allclose(q2, r2, atol=1e-2, rtol=1e-2)

    print("KERNEL_OK")
</pallas_src>

<mosaic_0001>
module attributes {stable_mosaic.version = 11 : i64} {
  func.func @critic_kernel(%arg0: i32, %arg1: memref<32x128xf32, #tpu.memory_space<vmem>>, %arg2: memref<8x128xf32, #tpu.memory_space<vmem>>, %arg3: memref<512x32xf32, #tpu.memory_space<vmem>>, %arg4: memref<512x8xf32, #tpu.memory_space<vmem>>, %arg5: memref<512x1xf32, #tpu.memory_space<vmem>>, %arg6: memref<256x256xf32, #tpu.memory_space<vmem>>, %arg7: memref<256x1xf32, #tpu.memory_space<vmem>>, %arg8: memref<256x256xf32, #tpu.memory_space<vmem>>, %arg9: memref<256x1xf32, #tpu.memory_space<vmem>>, %arg10: memref<1x256xf32, #tpu.memory_space<vmem>>, %arg11: memref<1x256xf32, #tpu.memory_space<vmem>>, %arg12: memref<2x1xf32, #tpu.memory_space<vmem>>, %arg13: memref<2x128xf32, #tpu.memory_space<vmem>>) attributes {dimension_semantics = [#tpu.dimension_semantics<parallel>], iteration_bounds = array<i64: 1>, scalar_prefetch = 0 : i64, scratch_operands = 0 : i64, tpu.core_type = #tpu.core_type<tc>, window_params = [{transform_indices = @transform_0, window_bounds = array<i64: 32, 128>}, {transform_indices = @transform_1, window_bounds = array<i64: 8, 128>}, {pipeline_mode = #tpu.pipeline_mode<synchronous>, transform_indices = @transform_2, window_bounds = array<i64: 512, 32>}, {pipeline_mode = #tpu.pipeline_mode<synchronous>, transform_indices = @transform_3, window_bounds = array<i64: 512, 8>}, {pipeline_mode = #tpu.pipeline_mode<synchronous>, transform_indices = @transform_4, window_bounds = array<i64: 512, 1>}, {pipeline_mode = #tpu.pipeline_mode<synchronous>, transform_indices = @transform_5, window_bounds = array<i64: 256, 256>}, {pipeline_mode = #tpu.pipeline_mode<synchronous>, transform_indices = @transform_6, window_bounds = array<i64: 256, 1>}, {pipeline_mode = #tpu.pipeline_mode<synchronous>, transform_indices = @transform_7, window_bounds = array<i64: 256, 256>}, {pipeline_mode = #tpu.pipeline_mode<synchronous>, transform_indices = @transform_8, window_bounds = array<i64: 256, 1>}, {pipeline_mode = #tpu.pipeline_mode<synchronous>, transform_indices = @transform_9, window_bounds = array<i64: 1, 256>}, {pipeline_mode = #tpu.pipeline_mode<synchronous>, transform_indices = @transform_10, window_bounds = array<i64: 1, 256>}, {pipeline_mode = #tpu.pipeline_mode<synchronous>, transform_indices = @transform_11, window_bounds = array<i64: 2, 1>}, {transform_indices = @transform_12, window_bounds = array<i64: 2, 128>}]} {
    %c0 = arith.constant 0 : index
    %c0_0 = arith.constant 0 : index
    %0 = vector.load %arg3[%c0, %c0_0] : memref<512x32xf32, #tpu.memory_space<vmem>>, vector<512x32xf32>
    %c0_1 = arith.constant 0 : index
    %c0_2 = arith.constant 0 : index
    %1 = vector.load %arg1[%c0_1, %c0_2] : memref<32x128xf32, #tpu.memory_space<vmem>>, vector<32x128xf32>
    %cst = arith.constant dense<0.000000e+00> : vector<512x128xf32>
    %2 = tpu.matmul %0, %1, %cst {dimension_numbers = #tpu.dot_dimension_numbers<[1], [0], [0], [1], [0, 0, 1, 1], [], []>} : vector<512x32xf32>, vector<32x128xf32>, vector<512x128xf32> -> vector<512x128xf32>
    %c0_3 = arith.constant 0 : index
    %c0_4 = arith.constant 0 : index
    %3 = vector.load %arg4[%c0_3, %c0_4] : memref<512x8xf32, #tpu.memory_space<vmem>>, vector<512x8xf32>
    %c0_5 = arith.constant 0 : index
    %c0_6 = arith.constant 0 : index
    %4 = vector.load %arg2[%c0_5, %c0_6] : memref<8x128xf32, #tpu.memory_space<vmem>>, vector<8x128xf32>
    %cst_7 = arith.constant dense<0.000000e+00> : vector<512x128xf32>
    %5 = tpu.matmul %3, %4, %cst_7 {dimension_numbers = #tpu.dot_dimension_numbers<[1], [0], [0], [1], [0, 0, 1, 1], [], []>} : vector<512x8xf32>, vector<8x128xf32>, vector<512x128xf32> -> vector<512x128xf32>
    %6 = arith.addf %2, %5 : vector<512x128xf32>
    %c0_8 = arith.constant 0 : index
    %c0_9 = arith.constant 0 : index
    %7 = vector.load %arg5[%c0_8, %c0_9] : memref<512x1xf32, #tpu.memory_space<vmem>>, vector<512x1xf32>
    %8 = vector.broadcast %7 : vector<512x1xf32> to vector<512x128xf32>
    %9 = arith.addf %6, %8 : vector<512x128xf32>
    %cst_10 = arith.constant 0.000000e+00 : f32
    %10 = vector.broadcast %cst_10 : f32 to vector<512x128xf32>
    %11 = arith.maximumf %9, %10 : vector<512x128xf32>
    %12 = vector.extract_strided_slice %11 {offsets = [0, 0], sizes = [256, 128], strides = [1, 1]} : vector<512x128xf32> to vector<256x128xf32>
    %13 = vector.extract_strided_slice %11 {offsets = [256, 0], sizes = [256, 128], strides = [1, 1]} : vector<512x128xf32> to vector<256x128xf32>
    %c0_11 = arith.constant 0 : index
    %c0_12 = arith.constant 0 : index
    %14 = vector.load %arg6[%c0_11, %c0_12] : memref<256x256xf32, #tpu.memory_space<vmem>>, vector<256x256xf32>
    %cst_13 = arith.constant dense<0.000000e+00> : vector<256x128xf32>
    %15 = tpu.matmul %14, %12, %cst_13 {dimension_numbers = #tpu.dot_dimension_numbers<[1], [0], [0], [1], [0, 0, 1, 1], [], []>} : vector<256x256xf32>, vector<256x128xf32>, vector<256x128xf32> -> vector<256x128xf32>
    %c0_14 = arith.constant 0 : index
    %c0_15 = arith.constant 0 : index
    %16 = vector.load %arg8[%c0_14, %c0_15] : memref<256x256xf32, #tpu.memory_space<vmem>>, vector<256x256xf32>
    %cst_16 = arith.constant dense<0.000000e+00> : vector<256x128xf32>
    %17 = tpu.matmul %16, %13, %cst_16 {dimension_numbers = #tpu.dot_dimension_numbers<[1], [0], [0], [1], [0, 0, 1, 1], [], []>} : vector<256x256xf32>, vector<256x128xf32>, vector<256x128xf32> -> vector<256x128xf32>
    %c0_17 = arith.constant 0 : index
    %c0_18 = arith.constant 0 : index
    %18 = vector.load %arg7[%c0_17, %c0_18] : memref<256x1xf32, #tpu.memory_space<vmem>>, vector<256x1xf32>
    %19 = vector.broadcast %18 : vector<256x1xf32> to vector<256x128xf32>
    %20 = arith.addf %15, %19 : vector<256x128xf32>
    %cst_19 = arith.constant 0.000000e+00 : f32
    %21 = vector.broadcast %cst_19 : f32 to vector<256x128xf32>
    %22 = arith.maximumf %20, %21 : vector<256x128xf32>
    %c0_20 = arith.constant 0 : index
    %c0_21 = arith.constant 0 : index
    %23 = vector.load %arg9[%c0_20, %c0_21] : memref<256x1xf32, #tpu.memory_space<vmem>>, vector<256x1xf32>
    %24 = vector.broadcast %23 : vector<256x1xf32> to vector<256x128xf32>
    %25 = arith.addf %17, %24 : vector<256x128xf32>
    %cst_22 = arith.constant 0.000000e+00 : f32
    %26 = vector.broadcast %cst_22 : f32 to vector<256x128xf32>
    %27 = arith.maximumf %25, %26 : vector<256x128xf32>
    %c0_23 = arith.constant 0 : index
    %c0_24 = arith.constant 0 : index
    %28 = vector.load %arg10[%c0_23, %c0_24] : memref<1x256xf32, #tpu.memory_space<vmem>>, vector<1x256xf32>
    %cst_25 = arith.constant dense<0.000000e+00> : vector<1x128xf32>
    %29 = tpu.matmul %28, %22, %cst_25 {dimension_numbers = #tpu.dot_dimension_numbers<[1], [0], [0], [1], [0, 0, 1, 1], [], []>} : vector<1x256xf32>, vector<256x128xf32>, vector<1x128xf32> -> vector<1x128xf32>
    %c0_26 = arith.constant 0 : index
    %c0_27 = arith.constant 0 : index
    %30 = vector.load %arg11[%c0_26, %c0_27] : memref<1x256xf32, #tpu.memory_space<vmem>>, vector<1x256xf32>
    %cst_28 = arith.constant dense<0.000000e+00> : vector<1x128xf32>
    %31 = tpu.matmul %30, %27, %cst_28 {dimension_numbers = #tpu.dot_dimension_numbers<[1], [0], [0], [1], [0, 0, 1, 1], [], []>} : vector<1x256xf32>, vector<256x128xf32>, vector<1x128xf32> -> vector<1x128xf32>
    %32 = tpu.concatenate %29, %31 in 0 : vector<1x128xf32>, vector<1x128xf32> -> vector<2x128xf32>
    %c0_29 = arith.constant 0 : index
    %c0_30 = arith.constant 0 : index
    %33 = vector.load %arg12[%c0_29, %c0_30] : memref<2x1xf32, #tpu.memory_space<vmem>>, vector<2x1xf32>
    %34 = vector.broadcast %33 : vector<2x1xf32> to vector<2x128xf32>
    %35 = arith.addf %32, %34 : vector<2x128xf32>
    %c0_31 = arith.constant 0 : index
    %c0_32 = arith.constant 0 : index
    %36 = vector.load %arg13[%c0_31, %c0_32] : memref<2x128xf32, #tpu.memory_space<vmem>>, vector<2x128xf32>
    tpu.vector_store %arg13[%c0_31, %c0_32], %35 {strides = array<i32>} : memref<2x128xf32, #tpu.memory_space<vmem>>, vector<2x128xf32>,
    return
  }
  func.func @transform_0(%arg0: i32) -> (i32, i32) {
    %c0_i32 = arith.constant 0 : i32
    %c0_i32_0 = arith.constant 0 : i32
    return %c0_i32, %arg0 : i32, i32
  }
  func.func @transform_1(%arg0: i32) -> (i32, i32) {
    %c0_i32 = arith.constant 0 : i32
    %c0_i32_0 = arith.constant 0 : i32
    return %c0_i32, %arg0 : i32, i32
  }
  func.func @transform_2(%arg0: i32) -> (i32, i32) {
    %c0_i32 = arith.constant 0 : i32
    %c0_i32_0 = arith.constant 0 : i32
    %c0_i32_1 = arith.constant 0 : i32
    return %c0_i32, %c0_i32_0 : i32, i32
  }
  func.func @transform_3(%arg0: i32) -> (i32, i32) {
    %c0_i32 = arith.constant 0 : i32
    %c0_i32_0 = arith.constant 0 : i32
    %c0_i32_1 = arith.constant 0 : i32
    return %c0_i32, %c0_i32_0 : i32, i32
  }
  func.func @transform_4(%arg0: i32) -> (i32, i32) {
    %c0_i32 = arith.constant 0 : i32
    %c0_i32_0 = arith.constant 0 : i32
    %c0_i32_1 = arith.constant 0 : i32
    return %c0_i32, %c0_i32_0 : i32, i32
  }
  func.func @transform_5(%arg0: i32) -> (i32, i32) {
    %c0_i32 = arith.constant 0 : i32
    %c0_i32_0 = arith.constant 0 : i32
    %c0_i32_1 = arith.constant 0 : i32
    return %c0_i32, %c0_i32_0 : i32, i32
  }
  func.func @transform_6(%arg0: i32) -> (i32, i32) {
    %c0_i32 = arith.constant 0 : i32
    %c0_i32_0 = arith.constant 0 : i32
    %c0_i32_1 = arith.constant 0 : i32
    return %c0_i32, %c0_i32_0 : i32, i32
  }
  func.func @transform_7(%arg0: i32) -> (i32, i32) {
    %c0_i32 = arith.constant 0 : i32
    %c0_i32_0 = arith.constant 0 : i32
    %c0_i32_1 = arith.constant 0 : i32
    return %c0_i32, %c0_i32_0 : i32, i32
  }
  func.func @transform_8(%arg0: i32) -> (i32, i32) {
    %c0_i32 = arith.constant 0 : i32
    %c0_i32_0 = arith.constant 0 : i32
    %c0_i32_1 = arith.constant 0 : i32
    return %c0_i32, %c0_i32_0 : i32, i32
  }
  func.func @transform_9(%arg0: i32) -> (i32, i32) {
    %c0_i32 = arith.constant 0 : i32
    %c0_i32_0 = arith.constant 0 : i32
    %c0_i32_1 = arith.constant 0 : i32
    return %c0_i32, %c0_i32_0 : i32, i32
  }
  func.func @transform_10(%arg0: i32) -> (i32, i32) {
    %c0_i32 = arith.constant 0 : i32
    %c0_i32_0 = arith.constant 0 : i32
    %c0_i32_1 = arith.constant 0 : i32
    return %c0_i32, %c0_i32_0 : i32, i32
  }
  func.func @transform_11(%arg0: i32) -> (i32, i32) {
    %c0_i32 = arith.constant 0 : i32
    %c0_i32_0 = arith.constant 0 : i32
    %c0_i32_1 = arith.constant 0 : i32
    return %c0_i32, %c0_i32_0 : i32, i32
  }
  func.func @transform_12(%arg0: i32) -> (i32, i32) {
    %c0_i32 = arith.constant 0 : i32
    %c0_i32_0 = arith.constant 0 : i32
    return %c0_i32, %arg0 : i32, i32
  }
}

</mosaic_0001>

<bundles_post_ra>
// kernel: critic_forward.1
= control target key start
LH: loop header
LB: loop body
LE: loop exit
PB: predicated region body
PF: predicated region fallthrough
CT: control target
= control target key end

     0   :  { %vm174_vm0 = vcmask 64512   ;;  %v3818_v0 = vmov 0   ;;  %vm752_vm1 = vcmask 261120   ;;  %vm3035_vm2 = vcmask 1040384   ;;  %s5527_s4 = inlined_call_operand.vmem [shape: f32[512,1], index: 4, kind: input, shape index: {}]   ;;  %s5528_s1 = inlined_call_operand.vmem [shape: f32[8,128], index: 1, kind: input, shape index: {}]   ;;  %s5529_s3 = inlined_call_operand.vmem [shape: f32[512,8], index: 3, kind: input, shape index: {}]   ;;  %s5530_s0 = inlined_call_operand.vmem [shape: f32[32,128], index: 0, kind: input, shape index: {}]   ;;  %s5531_s6 = inlined_call_operand.vmem [shape: f32[256,1], index: 6, kind: input, shape index: {}]   ;;  %s5532_s2 = inlined_call_operand.vmem [shape: f32[512,32], index: 2, kind: input, shape index: {}]   ;;  %s5533_s8 = inlined_call_operand.vmem [shape: f32[256,1], index: 8, kind: input, shape index: {}]   ;;  %s5534_s11 = inlined_call_operand.vmem [shape: f32[2,1], index: 11, kind: input, shape index: {}]   ;;  %s5535_s5 = inlined_call_operand.vmem [shape: f32[256,256], index: 5, kind: input, shape index: {}]   ;;  %s5536_s7 = inlined_call_operand.vmem [shape: f32[256,256], index: 7, kind: input, shape index: {}]   ;;  %s5537_s9 = inlined_call_operand.vmem [shape: f32[1,256], index: 9, kind: input, shape index: {}]   ;;  %s5538_s10 = inlined_call_operand.vmem [shape: f32[1,256], index: 10, kind: input, shape index: {}]   ;;  %s5539_s12 = inlined_call_operand.vmem [shape: f32[2,128], index: 12, kind: output, shape index: {}]  }
   0x1   :  { %3817 = vset.pattern.permute.xlu1 %v3818_v0  ;;  %3816 = vset.pattern.permute.xlu0 %v3818_v0  ;;  %v1332_v1 = vld [vmem:[%s5527_s4 + $0x10] sm:$0xff]  ;;  %v1330_v2 = vld [vmem:[%s5527_s4] sm:$0xff]  ;;  %v110_v5 = vld [vmem:[%s5529_s3 + $0x8] sm:$0xff] }
   0x2   :  { %v173_v3 = vld [vmem:[%s5528_s1] sm:$0xff]  ;;  %1406 = vperm.xlu1 %3817, %v1332_v1   ;;  %1396 = vperm.xlu0 %3816, %v1330_v2   ;;  %v106_v7 = vld [vmem:[%s5530_s0 + $0x8] sm:$0xff]  ;;  %v1333_v8 = vld [vmem:[%s5527_s4 + $0x18] sm:$0xff] }
   0x3   :  { %v109_v4 = vld [vmem:[%s5529_s3] sm:$0xff]  ;;  %3380 = vmatprep.subr.mxu0 %v173_v3  ;;  %v1331_v10 = vld [vmem:[%s5527_s4 + $0x8] sm:$0xff]  ;;  %v111_v11 = vld [vmem:[%s5529_s3 + $0x10] sm:$0xff] }
   0x4   :  { %v105_v6 = vld [vmem:[%s5530_s0] sm:$0xff]  ;;  %3382 = vmatprep.mubr.msk.f32.mxu0 %vm174_vm0, %v109_v4  ;;  %3381 = vmatpush3.msra.mxu0 %v173_v3  ;;  %v112_v12 = vld [vmem:[%s5529_s3 + $0x18] sm:$0xff]  ;;  %v1335_v13 = vld [vmem:[%s5527_s4 + $0x28] sm:$0xff] }
   0x5   :  { %v3582_v9 = vpack.c.bf16 %v106_v7, %v105_v6  ;;  %3383 = vmatmul.mubr.msk.f32.vlgmr.msra.gmra.mrb[0].mxu0 %vm174_vm0, %v110_v5  ;;  %v113_v14 = vld [vmem:[%s5529_s3 + $0x20] sm:$0xff]  ;;  %v114_v16 = vld [vmem:[%s5529_s3 + $0x28] sm:$0xff]  ;;  %v1337_v17 = vld [vmem:[%s5527_s4 + $0x38] sm:$0xff] }
   0x6   :  { %1411 = vperm.xlu1 %3817, %v1333_v8   ;;  %1401 = vperm.xlu0 %3816, %v1331_v10   ;;  %v1334_v15 = vld [vmem:[%s5527_s4 + $0x20] sm:$0xff]  ;;  %v115_v18 = vld [vmem:[%s5529_s3 + $0x30] sm:$0xff]  ;;  %v116_v20 = vld [vmem:[%s5529_s3 + $0x38] sm:$0xff] }
   0x7   :  { %3583 = vmatprep.subr.bf16.mxu0 %v3582_v9  ;;  %3385 = vmatprep.mubr.msk.f32.mxu0 %vm174_vm0, %v111_v11  ;;  %v1336_v19 = vld [vmem:[%s5527_s4 + $0x30] sm:$0xff]  ;;  %v1339_v21 = vld [vmem:[%s5527_s4 + $0x48] sm:$0xff]  ;;  %v117_v22 = vld [vmem:[%s5529_s3 + $0x40] sm:$0xff] }
   0x8   :  { %3585 = vmatpush3.bf16.msra.mxu0 %v3582_v9  ;;  %v1338_v23 = vld [vmem:[%s5527_s4 + $0x40] sm:$0xff]  ;;  %v118_v24 = vld [vmem:[%s5529_s3 + $0x48] sm:$0xff]  ;;  %v1341_v25 = vld [vmem:[%s5527_s4 + $0x58] sm:$0xff] }
   0x9   :  { %3386 = vmatmul.mubr.msk.f32.gmra.mrb[2].mxu0 %vm174_vm0, %v112_v12  ;;  %v119_v26 = vld [vmem:[%s5529_s3 + $0x50] sm:$0xff]  ;;  %v120_v28 = vld [vmem:[%s5529_s3 + $0x58] sm:$0xff]  ;;  %v1343_v29 = vld [vmem:[%s5527_s4 + $0x68] sm:$0xff] }
   0xa   :  { %1421 = vperm.xlu1 %3817, %v1335_v13   ;;  %3388 = vmatprep.mubr.msk.f32.mxu0 %vm174_vm0, %v113_v14  ;;  %v1340_v27 = vld [vmem:[%s5527_s4 + $0x50] sm:$0xff]  ;;  %v121_v30 = vld [vmem:[%s5529_s3 + $0x60] sm:$0xff]  ;;  %v108_v33 = vld [vmem:[%s5530_s0 + $0x18] sm:$0xff] }
   0xb   :  { %1416 = vperm.xlu0 %3816, %v1334_v15   ;;  %v1342_v31 = vld [vmem:[%s5527_s4 + $0x60] sm:$0xff]  ;;  %v107_v32 = vld [vmem:[%s5530_s0 + $0x10] sm:$0xff]  ;;  %v122_v34 = vld [vmem:[%s5529_s3 + $0x68] sm:$0xff] }
   0xc   :  { %v3586_v35 = vpack.c.bf16 %v108_v33, %v107_v32  ;;  %v1345_v36 = vld [vmem:[%s5527_s4 + $0x78] sm:$0xff]  ;;  %v123_v37 = vld [vmem:[%s5529_s3 + $0x70] sm:$0xff]  ;;  %v1347_v40 = vld [vmem:[%s5527_s4 + $0x88] sm:$0xff] }
   0xd   :  { %3389 = vmatmul.mubr.msk.f32.gmra.mrb[4].mxu0 %vm174_vm0, %v114_v16  ;;  %v1344_v38 = vld [vmem:[%s5527_s4 + $0x70] sm:$0xff]  ;;  %v124_v39 = vld [vmem:[%s5529_s3 + $0x78] sm:$0xff]  ;;  %v125_v41 = vld [vmem:[%s5529_s3 + $0x80] sm:$0xff] }
   0xe   :  { %1431 = vperm.xlu1 %3817, %v1337_v17   ;;  %3391 = vmatprep.mubr.msk.f32.mxu0 %vm174_vm0, %v115_v18  ;;  %v1346_v42 = vld [vmem:[%s5527_s4 + $0x80] sm:$0xff]  ;;  %v126_v43 = vld [vmem:[%s5529_s3 + $0x88] sm:$0xff]  ;;  %v1349_v44 = vld [vmem:[%s5527_s4 + $0x98] sm:$0xff] }
   0xf   :  { %1426 = vperm.xlu0 %3816, %v1336_v19   ;;  %3587 = vmatprep.subr.bf16.mxu0 %v3586_v35  ;;  %v127_v45 = vld [vmem:[%s5529_s3 + $0x90] sm:$0xff]  ;;  %v128_v47 = vld [vmem:[%s5529_s3 + $0x98] sm:$0xff]  ;;  %v1351_v48 = vld [vmem:[%s5527_s4 + $0xa8] sm:$0xff] }
  0x10   :  { %3589 = vmatpush3.bf16.msra.mxu0 %v3586_v35  ;;  %v1348_v46 = vld [vmem:[%s5527_s4 + $0x90] sm:$0xff]  ;;  %v129_v49 = vld [vmem:[%s5529_s3 + $0xa0] sm:$0xff]  ;;  %v130_v51 = vld [vmem:[%s5529_s3 + $0xa8] sm:$0xff] }
  0x11   :  { %3392 = vmatmul.mubr.msk.f32.gmra.mrb[6].mxu0 %vm174_vm0, %v116_v20  ;;  %v1350_v50 = vld [vmem:[%s5527_s4 + $0xa0] sm:$0xff]  ;;  %v1353_v52 = vld [vmem:[%s5527_s4 + $0xb8] sm:$0xff]  ;;  %v131_v53 = vld [vmem:[%s5529_s3 + $0xb0] sm:$0xff] }
  0x12   :  { %1441 = vperm.xlu1 %3817, %v1339_v21   ;;  %3394 = vmatprep.mubr.msk.f32.mxu0 %vm174_vm0, %v117_v22  ;;  %v1352_v54 = vld [vmem:[%s5527_s4 + $0xb0] sm:$0xff]  ;;  %v132_v55 = vld [vmem:[%s5529_s3 + $0xb8] sm:$0xff]  ;;  %v1355_v56 = vld [vmem:[%s5527_s4 + $0xc8] sm:$0xff] }
  0x13   :  { %1436 = vperm.xlu0 %3816, %v1338_v23   ;;  %v133_v57 = vld [vmem:[%s5529_s3 + $0xc0] sm:$0xff]  ;;  %v134_v59 = vld [vmem:[%s5529_s3 + $0xc8] sm:$0xff]  ;;  %v1357_v60 = vld [vmem:[%s5527_s4 + $0xd8] sm:$0xff] }
  0x14   :  { %v1354_v58 = vld [vmem:[%s5527_s4 + $0xc0] sm:$0xff]  ;;  %v135_v61 = vld [vmem:[%s5529_s3 + $0xd0] sm:$0xff]  ;;  %v136_v63 = vld [vmem:[%s5529_s3 + $0xd8] sm:$0xff] }
  0x15   :  { %3395 = vmatmul.mubr.msk.f32.gmra.mrb[8].mxu0 %vm174_vm0, %v118_v24  ;;  %v1356_v62 = vld [vmem:[%s5527_s4 + $0xd0] sm:$0xff]  ;;  %v1359_v0 = vld [vmem:[%s5527_s4 + $0xe8] sm:$0xff]  ;;  %v137_v1 = vld [vmem:[%s5529_s3 + $0xe0] sm:$0xff] }
  0x16   :  { %1451 = vperm.xlu1 %3817, %v1341_v25   ;;  %3397 = vmatprep.mubr.msk.f32.mxu0 %vm174_vm0, %v119_v26  ;;  %v1358_v2 = vld [vmem:[%s5527_s4 + $0xe0] sm:$0xff]  ;;  %v138_v3 = vld [vmem:[%s5529_s3 + $0xe8] sm:$0xff]  ;;  %v1361_v4 = vld [vmem:[%s5527_s4 + $0xf8] sm:$0xff] }
  0x17   :  { %1446 = vperm.xlu0 %3816, %v1340_v27   ;;  %v139_v5 = vld [vmem:[%s5529_s3 + $0xf0] sm:$0xff]  ;;  %v140_v7 = vld [vmem:[%s5529_s3 + $0xf8] sm:$0xff]  ;;  %v1363_v8 = vld [vmem:[%s5527_s4 + $0x108] sm:$0xff] }
  0x18   :  { %v1360_v6 = vld [vmem:[%s5527_s4 + $0xf0] sm:$0xff]  ;;  %v141_v9 = vld [vmem:[%s5529_s3 + $0x100] sm:$0xff]  ;;  %v142_v11 = vld [vmem:[%s5529_s3 + $0x108] sm:$0xff] }
  0x19   :  { %3398 = vmatmul.mubr.msk.f32.gmra.mrb[10].mxu0 %vm174_vm0, %v120_v28  ;;  %v1362_v10 = vld [vmem:[%s5527_s4 + $0x100] sm:$0xff]  ;;  %v1365_v12 = vld [vmem:[%s5527_s4 + $0x118] sm:$0xff]  ;;  %v143_v13 = vld [vmem:[%s5529_s3 + $0x110] sm:$0xff] }
  0x1a   :  { %1461 = vperm.xlu1 %3817, %v1343_v29   ;;  %3400 = vmatprep.mubr.msk.f32.mxu0 %vm174_vm0, %v121_v30  ;;  %v1364_v14 = vld [vmem:[%s5527_s4 + $0x110] sm:$0xff]  ;;  %v144_v15 = vld [vmem:[%s5529_s3 + $0x118] sm:$0xff]  ;;  %v1367_v16 = vld [vmem:[%s5527_s4 + $0x128] sm:$0xff] }
  0x1b   :  { %1456 = vperm.xlu0 %3816, %v1342_v31   ;;  %v145_v17 = vld [vmem:[%s5529_s3 + $0x120] sm:$0xff]  ;;  %v146_v19 = vld [vmem:[%s5529_s3 + $0x128] sm:$0xff]  ;;  %v1369_v20 = vld [vmem:[%s5527_s4 + $0x138] sm:$0xff] }
  0x1c   :  { %v1366_v18 = vld [vmem:[%s5527_s4 + $0x120] sm:$0xff]  ;;  %v147_v21 = vld [vmem:[%s5529_s3 + $0x130] sm:$0xff]  ;;  %v148_v23 = vld [vmem:[%s5529_s3 + $0x138] sm:$0xff] }
  0x1d   :  { %3401 = vmatmul.mubr.msk.f32.gmra.mrb[12].mxu0 %vm174_vm0, %v122_v34  ;;  %v1368_v22 = vld [vmem:[%s5527_s4 + $0x130] sm:$0xff]  ;;  %v1371_v24 = vld [vmem:[%s5527_s4 + $0x148] sm:$0xff]  ;;  %v149_v25 = vld [vmem:[%s5529_s3 + $0x140] sm:$0xff] }
  0x1e   :  { %1471 = vperm.xlu1 %3817, %v1345_v36   ;;  %3403 = vmatprep.mubr.msk.f32.mxu0 %vm174_vm0, %v123_v37  ;;  %v1370_v26 = vld [vmem:[%s5527_s4 + $0x140] sm:$0xff]  ;;  %v150_v27 = vld [vmem:[%s5529_s3 + $0x148] sm:$0xff]  ;;  %v1373_v28 = vld [vmem:[%s5527_s4 + $0x158] sm:$0xff] }
  0x1f   :  { %1466 = vperm.xlu0 %3816, %v1344_v38   ;;  %v151_v29 = vld [vmem:[%s5529_s3 + $0x150] sm:$0xff]  ;;  %v152_v31 = vld [vmem:[%s5529_s3 + $0x158] sm:$0xff]  ;;  %v1375_v32 = vld [vmem:[%s5527_s4 + $0x168] sm:$0xff] }
  0x20   :  { %v1372_v30 = vld [vmem:[%s5527_s4 + $0x150] sm:$0xff]  ;;  %v153_v33 = vld [vmem:[%s5529_s3 + $0x160] sm:$0xff]  ;;  %v154_v35 = vld [vmem:[%s5529_s3 + $0x168] sm:$0xff] }
  0x21   :  { %3404 = vmatmul.mubr.msk.f32.gmra.mrb[14].mxu0 %vm174_vm0, %v124_v39  ;;  %v1374_v34 = vld [vmem:[%s5527_s4 + $0x160] sm:$0xff]  ;;  %v1377_v36 = vld [vmem:[%s5527_s4 + $0x178] sm:$0xff]  ;;  %v155_v37 = vld [vmem:[%s5529_s3 + $0x170] sm:$0xff] }
  0x22   :  { %1481 = vperm.xlu1 %3817, %v1347_v40   ;;  %3406 = vmatprep.mubr.msk.f32.mxu0 %vm174_vm0, %v125_v41  ;;  %v1376_v38 = vld [vmem:[%s5527_s4 + $0x170] sm:$0xff]  ;;  %v156_v39 = vld [vmem:[%s5529_s3 + $0x178] sm:$0xff]  ;;  %v1379_v40 = vld [vmem:[%s5527_s4 + $0x188] sm:$0xff] }
  0x23   :  { %1476 = vperm.xlu0 %3816, %v1346_v42   ;;  %v157_v41 = vld [vmem:[%s5529_s3 + $0x180] sm:$0xff] }
  0x24   :  { %v1378_v42 = vld [vmem:[%s5527_s4 + $0x180] sm:$0xff] }
  0x25   :  { %3407 = vmatmul.mubr.msk.f32.gmra.mrb[16].mxu0 %vm174_vm0, %v126_v43  ;;  %v158_v43 = vld [vmem:[%s5529_s3 + $0x188] sm:$0xff] }
  0x26   :  { %1491 = vperm.xlu1 %3817, %v1349_v44   ;;  %3409 = vmatprep.mubr.msk.f32.mxu0 %vm174_vm0, %v127_v45  ;;  %v1381_v44 = vld [vmem:[%s5527_s4 + $0x198] sm:$0xff]  ;;  %v159_v45 = vld [vmem:[%s5529_s3 + $0x190] sm:$0xff] }
  0x27   :  { %1486 = vperm.xlu0 %3816, %v1348_v46   ;;  %v1380_v46 = vld [vmem:[%s5527_s4 + $0x190] sm:$0xff] }
  0x29   :  { %3410 = vmatmul.mubr.msk.f32.gmra.mrb[18].mxu0 %vm174_vm0, %v128_v47  ;;  %v160_v47 = vld [vmem:[%s5529_s3 + $0x198] sm:$0xff] }
  0x2a   :  { %1501 = vperm.xlu1 %3817, %v1351_v48   ;;  %3412 = vmatprep.mubr.msk.f32.mxu0 %vm174_vm0, %v129_v49  ;;  %v1383_v48 = vld [vmem:[%s5527_s4 + $0x1a8] sm:$0xff]  ;;  %v161_v49 = vld [vmem:[%s5529_s3 + $0x1a0] sm:$0xff] }
  0x2b   :  { %1496 = vperm.xlu0 %3816, %v1350_v50   ;;  %v1382_v50 = vld [vmem:[%s5527_s4 + $0x1a0] sm:$0xff] }
  0x2d   :  { %3413 = vmatmul.mubr.msk.f32.gmra.mrb[20].mxu0 %vm174_vm0, %v130_v51  ;;  %v162_v51 = vld [vmem:[%s5529_s3 + $0x1a8] sm:$0xff] }
  0x2e   :  { %1511 = vperm.xlu1 %3817, %v1353_v52   ;;  %3415 = vmatprep.mubr.msk.f32.mxu0 %vm174_vm0, %v131_v53  ;;  %v1385_v52 = vld [vmem:[%s5527_s4 + $0x1b8] sm:$0xff]  ;;  %v163_v53 = vld [vmem:[%s5529_s3 + $0x1b0] sm:$0xff] }
  0x2f   :  { %1506 = vperm.xlu0 %3816, %v1352_v54   ;;  %v1384_v54 = vld [vmem:[%s5527_s4 + $0x1b0] sm:$0xff] }
  0x31   :  { %3416 = vmatmul.mubr.msk.f32.gmra.mrb[22].mxu0 %vm174_vm0, %v132_v55  ;;  %v164_v55 = vld [vmem:[%s5529_s3 + $0x1b8] sm:$0xff] }
  0x32   :  { %1521 = vperm.xlu1 %3817, %v1355_v56   ;;  %3418 = vmatprep.mubr.msk.f32.mxu0 %vm174_vm0, %v133_v57  ;;  %v1387_v56 = vld [vmem:[%s5527_s4 + $0x1c8] sm:$0xff]  ;;  %v165_v57 = vld [vmem:[%s5529_s3 + $0x1c0] sm:$0xff] }
  0x33   :  { %1516 = vperm.xlu0 %3816, %v1354_v58   ;;  %v1386_v58 = vld [vmem:[%s5527_s4 + $0x1c0] sm:$0xff] }
  0x35   :  { %3419 = vmatmul.mubr.msk.f32.gmra.mrb[24].mxu0 %vm174_vm0, %v134_v59  ;;  %v166_v59 = vld [vmem:[%s5529_s3 + $0x1c8] sm:$0xff] }
  0x36   :  { %1531 = vperm.xlu1 %3817, %v1357_v60   ;;  %3421 = vmatprep.mubr.msk.f32.mxu0 %vm174_vm0, %v135_v61  ;;  %v1389_v60 = vld [vmem:[%s5527_s4 + $0x1d8] sm:$0xff]  ;;  %v167_v61 = vld [vmem:[%s5529_s3 + $0x1d0] sm:$0xff] }
  0x37   :  { %1526 = vperm.xlu0 %3816, %v1356_v62   ;;  %v1388_v62 = vld [vmem:[%s5527_s4 + $0x1d0] sm:$0xff] }
  0x39   :  { %3422 = vmatmul.mubr.msk.f32.gmra.mrb[26].mxu0 %vm174_vm0, %v136_v63  ;;  %v168_v63 = vld [vmem:[%s5529_s3 + $0x1d8] sm:$0xff] }
  0x3a   :  { %1541 = vperm.xlu1 %3817, %v1359_v0   ;;  %3424 = vmatprep.mubr.msk.f32.mxu0 %vm174_vm0, %v137_v1  ;;  %v1391_v0 = vld [vmem:[%s5527_s4 + $0x1e8] sm:$0xff]  ;;  %v169_v1 = vld [vmem:[%s5529_s3 + $0x1e0] sm:$0xff] }
  0x3b   :  { %1536 = vperm.xlu0 %3816, %v1358_v2   ;;  %v1390_v2 = vld [vmem:[%s5527_s4 + $0x1e0] sm:$0xff] }
  0x3d   :  { %3425 = vmatmul.mubr.msk.f32.gmra.mrb[28].mxu0 %vm174_vm0, %v138_v3  ;;  %v170_v3 = vld [vmem:[%s5529_s3 + $0x1e8] sm:$0xff] }
  0x3e   :  { %1551 = vperm.xlu1 %3817, %v1361_v4   ;;  %3427 = vmatprep.mubr.msk.f32.mxu0 %vm174_vm0, %v139_v5  ;;  %v1393_v4 = vld [vmem:[%s5527_s4 + $0x1f8] sm:$0xff]  ;;  %v171_v5 = vld [vmem:[%s5529_s3 + $0x1f0] sm:$0xff] }
  0x3f   :  { %1546 = vperm.xlu0 %3816, %v1360_v6   ;;  %v1392_v6 = vld [vmem:[%s5527_s4 + $0x1f0] sm:$0xff] }
  0x41   :  { %3428 = vmatmul.mubr.msk.f32.gmra.mrb[30].mxu0 %vm174_vm0, %v140_v7  ;;  %v172_v7 = vld [vmem:[%s5529_s3 + $0x1f8] sm:$0xff] }
  0x42   :  { %1561 = vperm.xlu1 %3817, %v1363_v8   ;;  %3430 = vmatprep.mubr.msk.f32.mxu0 %vm174_vm0, %v141_v9  ;;  %v1987_v8 = vld [vmem:[%s5531_s6 + $0x88] sm:$0xff]  ;;  %v41_v9 = vld [vmem:[%s5532_s2] sm:$0xff] }
  0x43   :  { %1556 = vperm.xlu0 %3816, %v1362_v10   ;;  %v1986_v10 = vld [vmem:[%s5531_s6 + $0x80] sm:$0xff] }
  0x45   :  { %3431 = vmatmul.mubr.msk.f32.gmra.mrb[32].mxu0 %vm174_vm0, %v142_v11  ;;  %v42_v11 = vld [vmem:[%s5532_s2 + $0x8] sm:$0xff] }
  0x46   :  { %1571 = vperm.xlu1 %3817, %v1365_v12   ;;  %3433 = vmatprep.mubr.msk.f32.mxu0 %vm174_vm0, %v143_v13  ;;  %v1971_v12 = vld [vmem:[%s5531_s6 + $0x8] sm:$0xff]  ;;  %v43_v13 = vld [vmem:[%s5532_s2 + $0x10] sm:$0xff] }
  0x47   :  { %1566 = vperm.xlu0 %3816, %v1364_v14   ;;  %v1970_v14 = vld [vmem:[%s5531_s6] sm:$0xff] }
  0x49   :  { %3434 = vmatmul.mubr.msk.f32.gmra.mrb[34].mxu0 %vm174_vm0, %v144_v15  ;;  %v44_v15 = vld [vmem:[%s5532_s2 + $0x18] sm:$0xff] }
  0x4a   :  { %1581 = vperm.xlu1 %3817, %v1367_v16   ;;  %3436 = vmatprep.mubr.msk.f32.mxu0 %vm174_vm0, %v145_v17  ;;  %v1989_v16 = vld [vmem:[%s5531_s6 + $0x98] sm:$0xff]  ;;  %v45_v17 = vld [vmem:[%s5532_s2 + $0x20] sm:$0xff] }
  0x4b   :  { %1576 = vperm.xlu0 %3816, %v1366_v18   ;;  %v1988_v18 = vld [vmem:[%s5531_s6 + $0x90] sm:$0xff] }
  0x4d   :  { %3437 = vmatmul.mubr.msk.f32.gmra.mrb[36].mxu0 %vm174_vm0, %v146_v19  ;;  %v46_v19 = vld [vmem:[%s5532_s2 + $0x28] sm:$0xff] }
  0x4e   :  { %1591 = vperm.xlu1 %3817, %v1369_v20   ;;  %3439 = vmatprep.mubr.msk.f32.mxu0 %vm174_vm0, %v147_v21  ;;  %v1973_v20 = vld [vmem:[%s5531_s6 + $0x18] sm:$0xff]  ;;  %v47_v21 = vld [vmem:[%s5532_s2 + $0x30] sm:$0xff] }
  0x4f   :  { %1586 = vperm.xlu0 %3816, %v1368_v22   ;;  %v1972_v22 = vld [vmem:[%s5531_s6 + $0x10] sm:$0xff] }
  0x51   :  { %3440 = vmatmul.mubr.msk.f32.gmra.mrb[38].mxu0 %vm174_vm0, %v148_v23  ;;  %v48_v23 = vld [vmem:[%s5532_s2 + $0x38] sm:$0xff] }
  0x52   :  { %1601 = vperm.xlu1 %3817, %v1371_v24   ;;  %3442 = vmatprep.mubr.msk.f32.mxu0 %vm174_vm0, %v149_v25  ;;  %v1991_v24 = vld [vmem:[%s5531_s6 + $0xa8] sm:$0xff]  ;;  %v49_v25 = vld [vmem:[%s5532_s2 + $0x40] sm:$0xff] }
  0x53   :  { %1596 = vperm.xlu0 %3816, %v1370_v26   ;;  %v1990_v26 = vld [vmem:[%s5531_s6 + $0xa0] sm:$0xff] }
  0x55   :  { %3443 = vmatmul.mubr.msk.f32.gmra.mrb[40].mxu0 %vm174_vm0, %v150_v27  ;;  %v50_v27 = vld [vmem:[%s5532_s2 + $0x48] sm:$0xff] }
  0x56   :  { %1611 = vperm.xlu1 %3817, %v1373_v28   ;;  %3445 = vmatprep.mubr.msk.f32.mxu0 %vm174_vm0, %v151_v29  ;;  %v1975_v28 = vld [vmem:[%s5531_s6 + $0x28] sm:$0xff]  ;;  %v51_v29 = vld [vmem:[%s5532_s2 + $0x50] sm:$0xff] }
  0x57   :  { %1606 = vperm.xlu0 %3816, %v1372_v30   ;;  %v1974_v30 = vld [vmem:[%s5531_s6 + $0x20] sm:$0xff] }
  0x59   :  { %3446 = vmatmul.mubr.msk.f32.gmra.mrb[42].mxu0 %vm174_vm0, %v152_v31  ;;  %v52_v31 = vld [vmem:[%s5532_s2 + $0x58] sm:$0xff] }
  0x5a   :  { %1621 = vperm.xlu1 %3817, %v1375_v32   ;;  %3448 = vmatprep.mubr.msk.f32.mxu0 %vm174_vm0, %v153_v33  ;;  %v1993_v32 = vld [vmem:[%s5531_s6 + $0xb8] sm:$0xff]  ;;  %v53_v33 = vld [vmem:[%s5532_s2 + $0x60] sm:$0xff] }
  0x5b   :  { %1616 = vperm.xlu0 %3816, %v1374_v34   ;;  %v1992_v34 = vld [vmem:[%s5531_s6 + $0xb0] sm:$0xff] }
  0x5d   :  { %3449 = vmatmul.mubr.msk.f32.gmra.mrb[44].mxu0 %vm174_vm0, %v154_v35  ;;  %v54_v35 = vld [vmem:[%s5532_s2 + $0x68] sm:$0xff] }
  0x5e   :  { %1631 = vperm.xlu1 %3817, %v1377_v36   ;;  %3451 = vmatprep.mubr.msk.f32.mxu0 %vm174_vm0, %v155_v37  ;;  %v1977_v36 = vld [vmem:[%s5531_s6 + $0x38] sm:$0xff]  ;;  %v55_v37 = vld [vmem:[%s5532_s2 + $0x70] sm:$0xff] }
  0x5f   :  { %1626 = vperm.xlu0 %3816, %v1376_v38   ;;  %v1976_v38 = vld [vmem:[%s5531_s6 + $0x30] sm:$0xff] }
  0x61   :  { %3452 = vmatmul.mubr.msk.f32.gmra.mrb[46].mxu0 %vm174_vm0, %v156_v39  ;;  %v56_v39 = vld [vmem:[%s5532_s2 + $0x78] sm:$0xff] }
  0x62   :  { %1641 = vperm.xlu1 %3817, %v1379_v40   ;;  %3454 = vmatprep.mubr.msk.f32.mxu0 %vm174_vm0, %v157_v41  ;;  %v1995_v40 = vld [vmem:[%s5531_s6 + $0xc8] sm:$0xff]  ;;  %v57_v41 = vld [vmem:[%s5532_s2 + $0x80] sm:$0xff] }
  0x63   :  { %1636 = vperm.xlu0 %3816, %v1378_v42   ;;  %v1994_v42 = vld [vmem:[%s5531_s6 + $0xc0] sm:$0xff] }
  0x65   :  { %3455 = vmatmul.mubr.msk.f32.gmra.mrb[48].mxu0 %vm174_vm0, %v158_v43  ;;  %v58_v43 = vld [vmem:[%s5532_s2 + $0x88] sm:$0xff] }
  0x66   :  { %1651 = vperm.xlu1 %3817, %v1381_v44   ;;  %3457 = vmatprep.mubr.msk.f32.mxu0 %vm174_vm0, %v159_v45  ;;  %v1979_v44 = vld [vmem:[%s5531_s6 + $0x48] sm:$0xff]  ;;  %v59_v45 = vld [vmem:[%s5532_s2 + $0x90] sm:$0xff] }
  0x67   :  { %1646 = vperm.xlu0 %3816, %v1380_v46   ;;  %v1978_v46 = vld [vmem:[%s5531_s6 + $0x40] sm:$0xff] }
  0x69   :  { %3458 = vmatmul.mubr.msk.f32.gmra.mrb[50].mxu0 %vm174_vm0, %v160_v47  ;;  %v60_v47 = vld [vmem:[%s5532_s2 + $0x98] sm:$0xff] }
  0x6a   :  { %1661 = vperm.xlu1 %3817, %v1383_v48   ;;  %3460 = vmatprep.mubr.msk.f32.mxu0 %vm174_vm0, %v161_v49  ;;  %v1997_v48 = vld [vmem:[%s5531_s6 + $0xd8] sm:$0xff]  ;;  %v61_v49 = vld [vmem:[%s5532_s2 + $0xa0] sm:$0xff] }
  0x6b   :  { %1656 = vperm.xlu0 %3816, %v1382_v50   ;;  %v1996_v50 = vld [vmem:[%s5531_s6 + $0xd0] sm:$0xff] }
  0x6d   :  { %3461 = vmatmul.mubr.msk.f32.gmra.mrb[52].mxu0 %vm174_vm0, %v162_v51 }
  0x6e   :  { %1671 = vperm.xlu1 %3817, %v1385_v52   ;;  %3463 = vmatprep.mubr.msk.f32.mxu0 %vm174_vm0, %v163_v53  ;;  %v62_v53 = vld [vmem:[%s5532_s2 + $0xa8] sm:$0xff] }
  0x6f   :  { %1666 = vperm.xlu0 %3816, %v1384_v54   ;;  %v1981_v54 = vld [vmem:[%s5531_s6 + $0x58] sm:$0xff] }
  0x71   :  { %3464 = vmatmul.mubr.msk.f32.gmra.mrb[54].mxu0 %vm174_vm0, %v164_v55  ;;  %v63_v55 = vld [vmem:[%s5532_s2 + $0xb0] sm:$0xff] }
  0x72   :  { %1681 = vperm.xlu1 %3817, %v1387_v56   ;;  %3466 = vmatprep.mubr.msk.f32.mxu0 %vm174_vm0, %v165_v57  ;;  %v1980_v56 = vld [vmem:[%s5531_s6 + $0x50] sm:$0xff]  ;;  %v64_v57 = vld [vmem:[%s5532_s2 + $0xb8] sm:$0xff] }
  0x73   :  { %1676 = vperm.xlu0 %3816, %v1386_v58  }
  0x75   :  { %3467 = vmatmul.mubr.msk.f32.gmra.mrb[56].mxu0 %vm174_vm0, %v166_v59  ;;  %v1999_v59 = vld [vmem:[%s5531_s6 + $0xe8] sm:$0xff] }
  0x76   :  { %1691 = vperm.xlu1 %3817, %v1389_v60   ;;  %3469 = vmatprep.mubr.msk.f32.mxu0 %vm174_vm0, %v167_v61  ;;  %v65_v60 = vld [vmem:[%s5532_s2 + $0xc0] sm:$0xff] }
  0x77   :  { %1686 = vperm.xlu0 %3816, %v1388_v62   ;;  %v1998_v62 = vld [vmem:[%s5531_s6 + $0xe0] sm:$0xff] }
  0x79   :  { %3470 = vmatmul.mubr.msk.f32.gmra.mrb[58].mxu0 %vm174_vm0, %v168_v63  ;;  %v66_v63 = vld [vmem:[%s5532_s2 + $0xc8] sm:$0xff] }
  0x7a   :  { %1701 = vperm.xlu1 %3817, %v1391_v0   ;;  %3472 = vmatprep.mubr.msk.f32.mxu0 %vm174_vm0, %v169_v1  ;;  %v1983_v0 = vld [vmem:[%s5531_s6 + $0x68] sm:$0xff]  ;;  %v67_v1 = vld [vmem:[%s5532_s2 + $0xd0] sm:$0xff] }
  0x7b   :  { %1696 = vperm.xlu0 %3816, %v1390_v2   ;;  %v1982_v2 = vld [vmem:[%s5531_s6 + $0x60] sm:$0xff] }
  0x7d   :  { %3473 = vmatmul.mubr.msk.f32.gmra.mrb[60].mxu0 %vm174_vm0, %v170_v3 }
  0x7e   :  { %1711 = vperm.xlu1 %3817, %v1393_v4   ;;  %3475 = vmatprep.mubr.msk.f32.mxu0 %vm174_vm0, %v171_v5  ;;  %v68_v5 = vld [vmem:[%s5532_s2 + $0xd8] sm:$0xff] }
  0x7f   :  { %1706 = vperm.xlu0 %3816, %v1392_v6   ;;  %v2001_v6 = vld [vmem:[%s5531_s6 + $0xf8] sm:$0xff] }
  0x81   :  { %3476 = vmatmul.mubr.msk.f32.gmra.mrb[62].mxu0 %vm174_vm0, %v172_v7  ;;  %v4496_v51 = vpop.permute.xlu0 %1396  ;;  %v4499_v52 = vpop.permute.xlu1 %1406  ;;  %v69_v7 = vld [vmem:[%s5532_s2 + $0xe0] sm:$0xff] }
  0x82   :  { %2089 = vperm.xlu1 %3817, %v1987_v8   ;;  %3486 = vmatprep.mubr.msk.f32.mxu0 %vm752_vm1, %v41_v9  ;;  %v2000_v8 = vld [vmem:[%s5531_s6 + $0xf0] sm:$0xff]  ;;  %v70_v9 = vld [vmem:[%s5532_s2 + $0xe8] sm:$0xff] }
  0x83   :  { %2084 = vperm.xlu0 %3816, %v1986_v10  }
  0x85   :  { %3487 = vmatmul.mubr.msk.f32.vlgmr.msra.gmra.mrb[0].mxu0 %vm752_vm1, %v42_v11  ;;  %v4519_v58 = vpop.permute.xlu0 %1401  ;;  %v4527_v61 = vpop.permute.xlu1 %1411  ;;  %v1985_v11 = vld [vmem:[%s5531_s6 + $0x78] sm:$0xff] }
  0x86   :  { %2009 = vperm.xlu1 %3817, %v1971_v12   ;;  %3489 = vmatprep.mubr.msk.f32.mxu0 %vm752_vm1, %v43_v13  ;;  %v71_v12 = vld [vmem:[%s5532_s2 + $0xf0] sm:$0xff] }
  0x87   :  { %2004 = vperm.xlu0 %3816, %v1970_v14   ;;  %v1984_v14 = vld [vmem:[%s5531_s6 + $0x70] sm:$0xff] }
  0x89   :  { %3490 = vmatmul.mubr.msk.f32.gmra.mrb[2].mxu0 %vm752_vm1, %v44_v15  ;;  %v4549_v4 = vpop.permute.xlu1 %1421  ;;  %v72_v15 = vld [vmem:[%s5532_s2 + $0xf8] sm:$0xff] }
  0x8a   :  { %2099 = vperm.xlu1 %3817, %v1989_v16   ;;  %3492 = vmatprep.mubr.msk.f32.mxu0 %vm752_vm1, %v45_v17  ;;  %v4546_v3 = vpop.permute.xlu0 %1416  ;;  %v2436_v16 = vld [vmem:[%s5533_s8 + $0x88] sm:$0xff]  ;;  %v73_v17 = vld [vmem:[%s5532_s2 + $0x100] sm:$0xff] }
  0x8b   :  { %2094 = vperm.xlu0 %3816, %v1988_v18   ;;  %v2435_v18 = vld [vmem:[%s5533_s8 + $0x80] sm:$0xff] }
  0x8d   :  { %3493 = vmatmul.mubr.msk.f32.gmra.mrb[4].mxu0 %vm752_vm1, %v46_v19  ;;  %v4577_v13 = vpop.permute.xlu1 %1431 }
  0x8e   :  { %2019 = vperm.xlu1 %3817, %v1973_v20   ;;  %3495 = vmatprep.mubr.msk.f32.mxu0 %vm752_vm1, %v47_v21  ;;  %v4569_v10 = vpop.permute.xlu0 %1426  ;;  %v74_v21 = vld [vmem:[%s5532_s2 + $0x108] sm:$0xff] }
  0x8f   :  { %2014 = vperm.xlu0 %3816, %v1972_v22   ;;  %v2420_v22 = vld [vmem:[%s5533_s8 + $0x8] sm:$0xff] }
  0x91   :  { %3496 = vmatmul.mubr.msk.f32.gmra.mrb[6].mxu0 %vm752_vm1, %v48_v23  ;;  %v4599_v20 = vpop.permute.xlu1 %1441  ;;  %v75_v23 = vld [vmem:[%s5532_s2 + $0x110] sm:$0xff] }
  0x92   :  { %2109 = vperm.xlu1 %3817, %v1991_v24   ;;  %3498 = vmatprep.mubr.msk.f32.mxu0 %vm752_vm1, %v49_v25  ;;  %v4596_v19 = vpop.permute.xlu0 %1436  ;;  %v2419_v24 = vld [vmem:[%s5533_s8] sm:$0xff]  ;;  %v76_v25 = vld [vmem:[%s5532_s2 + $0x118] sm:$0xff] }
  0x93   :  { %2104 = vperm.xlu0 %3816, %v1990_v26  }
  0x95   :  { %3499 = vmatmul.mubr.msk.f32.gmra.mrb[8].mxu0 %vm752_vm1, %v50_v27  ;;  %v2438_v27 = vld [vmem:[%s5533_s8 + $0x98] sm:$0xff] }
  0x96   :  { %2029 = vperm.xlu1 %3817, %v1975_v28   ;;  %3501 = vmatprep.mubr.msk.f32.mxu0 %vm752_vm1, %v51_v29  ;;  %v4619_v26 = vpop.permute.xlu0 %1446  ;;  %v77_v28 = vld [vmem:[%s5532_s2 + $0x120] sm:$0xff]  ;;  %v4627_v29 = vpop.permute.xlu1 %1451 }
  0x97   :  { %2024 = vperm.xlu0 %3816, %v1974_v30   ;;  %v2437_v30 = vld [vmem:[%s5533_s8 + $0x90] sm:$0xff] }
  0x99   :  { %3502 = vmatmul.mubr.msk.f32.gmra.mrb[10].mxu0 %vm752_vm1, %v52_v31  ;;  %v78_v31 = vld [vmem:[%s5532_s2 + $0x128] sm:$0xff] }
  0x9a   :  { %2119 = vperm.xlu1 %3817, %v1993_v32   ;;  %3504 = vmatprep.mubr.msk.f32.mxu0 %vm752_vm1, %v53_v33  ;;  %v2422_v32 = vld [vmem:[%s5533_s8 + $0x18] sm:$0xff]  ;;  %v79_v33 = vld [vmem:[%s5532_s2 + $0x130] sm:$0xff] }
  0x9b   :  { %2114 = vperm.xlu0 %3816, %v1992_v34   ;;  %v2421_v34 = vld [vmem:[%s5533_s8 + $0x10] sm:$0xff] }
  0x9d   :  { %3505 = vmatmul.mubr.msk.f32.gmra.mrb[12].mxu0 %vm752_vm1, %v54_v35  ;;  %v4646_v35 = vpop.permute.xlu0 %1456 }
  0x9e   :  { %2039 = vperm.xlu1 %3817, %v1977_v36   ;;  %3507 = vmatprep.mubr.msk.f32.mxu0 %vm752_vm1, %v55_v37  ;;  %v4649_v36 = vpop.permute.xlu1 %1461  ;;  %v80_v37 = vld [vmem:[%s5532_s2 + $0x138] sm:$0xff] }
  0x9f   :  { %2034 = vperm.xlu0 %3816, %v1976_v38   ;;  %v2440_v38 = vld [vmem:[%s5533_s8 + $0xa8] sm:$0xff] }
  0xa1   :  { %3508 = vmatmul.mubr.msk.f32.gmra.mrb[14].mxu0 %vm752_vm1, %v56_v39  ;;  %v81_v39 = vld [vmem:[%s5532_s2 + $0x140] sm:$0xff] }
  0xa2   :  { %2129 = vperm.xlu1 %3817, %v1995_v40   ;;  %3510 = vmatprep.mubr.msk.f32.mxu0 %vm752_vm1, %v57_v41  ;;  %v2439_v40 = vld [vmem:[%s5533_s8 + $0xa0] sm:$0xff]  ;;  %v82_v41 = vld [vmem:[%s5532_s2 + $0x148] sm:$0xff] }
  0xa3   :  { %2124 = vperm.xlu0 %3816, %v1994_v42   ;;  %v4669_v42 = vpop.permute.xlu0 %1466 }
  0xa5   :  { %3511 = vmatmul.mubr.msk.f32.gmra.mrb[16].mxu0 %vm752_vm1, %v58_v43  ;;  %v2424_v43 = vld [vmem:[%s5533_s8 + $0x28] sm:$0xff] }
  0xa6   :  { %2049 = vperm.xlu1 %3817, %v1979_v44   ;;  %3513 = vmatprep.mubr.msk.f32.mxu0 %vm752_vm1, %v59_v45  ;;  %v83_v44 = vld [vmem:[%s5532_s2 + $0x150] sm:$0xff]  ;;  %v4677_v45 = vpop.permute.xlu1 %1471 }
  0xa7   :  { %2044 = vperm.xlu0 %3816, %v1978_v46   ;;  %v2423_v46 = vld [vmem:[%s5533_s8 + $0x20] sm:$0xff] }
  0xa9   :  { %3514 = vmatmul.mubr.msk.f32.gmra.mrb[18].mxu0 %vm752_vm1, %v60_v47  ;;  %v84_v47 = vld [vmem:[%s5532_s2 + $0x158] sm:$0xff] }
  0xaa   :  { %2139 = vperm.xlu1 %3817, %v1997_v48   ;;  %3516 = vmatprep.mubr.msk.f32.mxu0 %vm752_vm1, %v61_v49  ;;  %v2442_v48 = vld [vmem:[%s5533_s8 + $0xb8] sm:$0xff]  ;;  %v85_v49 = vld [vmem:[%s5532_s2 + $0x160] sm:$0xff] }
  0xab   :  { %2134 = vperm.xlu0 %3816, %v1996_v50   ;;  %v2441_v50 = vld [vmem:[%s5533_s8 + $0xb0] sm:$0xff] }
  0xad   :  { %3517 = vmatmul.mubr.msk.f32.gmra.mrb[20].mxu0 %vm752_vm1, %v62_v53  ;;  %v4696_v53 = vpop.permute.xlu0 %1476 }
  0xae   :  { %2059 = vperm.xlu1 %3817, %v1981_v54   ;;  %3519 = vmatprep.mubr.msk.f32.mxu0 %vm752_vm1, %v63_v55  ;;  %v4699_v54 = vpop.permute.xlu1 %1481  ;;  %v86_v55 = vld [vmem:[%s5532_s2 + $0x168] sm:$0xff] }
  0xaf   :  { %2054 = vperm.xlu0 %3816, %v1980_v56   ;;  %v2426_v56 = vld [vmem:[%s5533_s8 + $0x38] sm:$0xff] }
  0xb1   :  { %3520 = vmatmul.mubr.msk.f32.gmra.mrb[22].mxu0 %vm752_vm1, %v64_v57  ;;  %v87_v57 = vld [vmem:[%s5532_s2 + $0x170] sm:$0xff] }
  0xb2   :  { %2149 = vperm.xlu1 %3817, %v1999_v59   ;;  %3522 = vmatprep.mubr.msk.f32.mxu0 %vm752_vm1, %v65_v60  ;;  %v2425_v59 = vld [vmem:[%s5533_s8 + $0x30] sm:$0xff]  ;;  %v88_v60 = vld [vmem:[%s5532_s2 + $0x178] sm:$0xff] }
  0xb3   :  { %2144 = vperm.xlu0 %3816, %v1998_v62   ;;  %v4719_v62 = vpop.permute.xlu0 %1486 }
  0xb5   :  { %3523 = vmatmul.mubr.msk.f32.gmra.mrb[24].mxu0 %vm752_vm1, %v66_v63  ;;  %v2444_v63 = vld [vmem:[%s5533_s8 + $0xc8] sm:$0xff] }
  0xb6   :  { %2069 = vperm.xlu1 %3817, %v1983_v0   ;;  %3525 = vmatprep.mubr.msk.f32.mxu0 %vm752_vm1, %v67_v1  ;;  %v89_v0 = vld [vmem:[%s5532_s2 + $0x180] sm:$0xff]  ;;  %v3819_v1 = vmov 0.0|0.0  }
  0xb7   :  { %2064 = vperm.xlu0 %3816, %v1982_v2   ;;  %3590 = vmatprep.subr.bf16.mxu1 %v3819_v1  ;;  %v4728_v2 = vpop.permute.xlu1 %1491 }
  0xb9   :  { %3526 = vmatmul.mubr.msk.f32.gmra.mrb[26].mxu0 %vm752_vm1, %v68_v5  ;;  %v2443_v5 = vld [vmem:[%s5533_s8 + $0xc0] sm:$0xff] }
  0xba   :  { %2159 = vperm.xlu1 %3817, %v2001_v6   ;;  %3528 = vmatprep.mubr.msk.f32.mxu0 %vm752_vm1, %v69_v7  ;;  %v90_v6 = vld [vmem:[%s5532_s2 + $0x188] sm:$0xff] }
  0xbb   :  { %2154 = vperm.xlu0 %3816, %v2000_v8   ;;  %v2428_v7 = vld [vmem:[%s5533_s8 + $0x48] sm:$0xff]  ;;  %v91_v8 = vld [vmem:[%s5532_s2 + $0x190] sm:$0xff] }
  0xbd   :  { %3529 = vmatmul.mubr.msk.f32.gmra.mrb[28].mxu0 %vm752_vm1, %v70_v9  ;;  %v2427_v9 = vld [vmem:[%s5533_s8 + $0x40] sm:$0xff] }
  0xbe   :  { %2079 = vperm.xlu1 %3817, %v1985_v11   ;;  %3531 = vmatprep.mubr.msk.f32.mxu0 %vm752_vm1, %v71_v12  ;;  %v4747_v11 = vpop.permute.xlu0 %1496  ;;  %v4750_v12 = vpop.permute.xlu1 %1501 }
  0xbf   :  { %2074 = vperm.xlu0 %3816, %v1984_v14   ;;  %v92_v14 = vld [vmem:[%s5532_s2 + $0x198] sm:$0xff] }
  0xc1   :  { %3532 = vmatmul.mubr.msk.f32.gmra.mrb[30].mxu0 %vm752_vm1, %v72_v15  ;;  %v2446_v15 = vld [vmem:[%s5533_s8 + $0xd8] sm:$0xff] }
  0xc2   :  { %2538 = vperm.xlu1 %3817, %v2436_v16   ;;  %3534 = vmatprep.mubr.msk.f32.mxu0 %vm752_vm1, %v73_v17  ;;  %v93_v16 = vld [vmem:[%s5532_s2 + $0x1a0] sm:$0xff]  ;;  %v2445_v17 = vld [vmem:[%s5533_s8 + $0xd0] sm:$0xff] }
  0xc3   :  { %2533 = vperm.xlu0 %3816, %v2435_v18   ;;  %v94_v18 = vld [vmem:[%s5532_s2 + $0x1a8] sm:$0xff] }
  0xc5   :  { %3535 = vmatmul.mubr.msk.f32.gmra.mrb[32].mxu0 %vm752_vm1, %v74_v21  ;;  %v4770_v21 = vpop.permute.xlu0 %1506 }
  0xc6   :  { %2458 = vperm.xlu1 %3817, %v2420_v22   ;;  %3537 = vmatprep.mubr.msk.f32.mxu0 %vm752_vm1, %v75_v23  ;;  %v2430_v22 = vld [vmem:[%s5533_s8 + $0x58] sm:$0xff]  ;;  %v95_v23 = vld [vmem:[%s5532_s2 + $0x1b0] sm:$0xff] }
  0xc7   :  { %2453 = vperm.xlu0 %3816, %v2419_v24   ;;  %v4778_v24 = vpop.permute.xlu1 %1511 }
  0xc9   :  { %3538 = vmatmul.mubr.msk.f32.gmra.mrb[34].mxu0 %vm752_vm1, %v76_v25  ;;  %v2429_v25 = vld [vmem:[%s5533_s8 + $0x50] sm:$0xff] }
  0xca   :  { %2548 = vperm.xlu1 %3817, %v2438_v27   ;;  %3540 = vmatprep.mubr.msk.f32.mxu0 %vm752_vm1, %v77_v28  ;;  %v96_v27 = vld [vmem:[%s5532_s2 + $0x1b8] sm:$0xff]  ;;  %v2448_v28 = vld [vmem:[%s5533_s8 + $0xe8] sm:$0xff] }
  0xcb   :  { %2543 = vperm.xlu0 %3816, %v2437_v30   ;;  %v97_v30 = vld [vmem:[%s5532_s2 + $0x1c0] sm:$0xff] }
  0xcd   :  { %3541 = vmatmul.mubr.msk.f32.gmra.mrb[36].mxu0 %vm752_vm1, %v78_v31  ;;  %v2447_v31 = vld [vmem:[%s5533_s8 + $0xe0] sm:$0xff] }
  0xce   :  { %2468 = vperm.xlu1 %3817, %v2422_v32   ;;  %3543 = vmatprep.mubr.msk.f32.mxu0 %vm752_vm1, %v79_v33  ;;  %v4797_v32 = vpop.permute.xlu0 %1516  ;;  %v4800_v33 = vpop.permute.xlu1 %1521 }
  0xcf   :  { %2463 = vperm.xlu0 %3816, %v2421_v34   ;;  %v98_v34 = vld [vmem:[%s5532_s2 + $0x1c8] sm:$0xff] }
  0xd1   :  { %3544 = vmatmul.mubr.msk.f32.gmra.mrb[38].mxu0 %vm752_vm1, %v80_v37  ;;  %v2432_v37 = vld [vmem:[%s5533_s8 + $0x68] sm:$0xff] }
  0xd2   :  { %2558 = vperm.xlu1 %3817, %v2440_v38   ;;  %3546 = vmatprep.mubr.msk.f32.mxu0 %vm752_vm1, %v81_v39  ;;  %v99_v38 = vld [vmem:[%s5532_s2 + $0x1d0] sm:$0xff]  ;;  %v2431_v39 = vld [vmem:[%s5533_s8 + $0x60] sm:$0xff] }
  0xd3   :  { %2553 = vperm.xlu0 %3816, %v2439_v40   ;;  %v100_v40 = vld [vmem:[%s5532_s2 + $0x1d8] sm:$0xff] }
  0xd5   :  { %3547 = vmatmul.mubr.msk.f32.gmra.mrb[40].mxu0 %vm752_vm1, %v82_v41  ;;  %v4820_v41 = vpop.permute.xlu0 %1526 }
  0xd6   :  { %2478 = vperm.xlu1 %3817, %v2424_v43   ;;  %3549 = vmatprep.mubr.msk.f32.mxu0 %vm752_vm1, %v83_v44  ;;  %v2450_v43 = vld [vmem:[%s5533_s8 + $0xf8] sm:$0xff]  ;;  %v101_v44 = vld [vmem:[%s5532_s2 + $0x1e0] sm:$0xff] }
  0xd7   :  { %2473 = vperm.xlu0 %3816, %v2423_v46   ;;  %v4828_v46 = vpop.permute.xlu1 %1531 }
  0xd9   :  { %3550 = vmatmul.mubr.msk.f32.gmra.mrb[42].mxu0 %vm752_vm1, %v84_v47  ;;  %v2449_v47 = vld [vmem:[%s5533_s8 + $0xf0] sm:$0xff] }
  0xda   :  { %2568 = vperm.xlu1 %3817, %v2442_v48   ;;  %3552 = vmatprep.mubr.msk.f32.mxu0 %vm752_vm1, %v85_v49  ;;  %v102_v48 = vld [vmem:[%s5532_s2 + $0x1e8] sm:$0xff]  ;;  %v2434_v49 = vld [vmem:[%s5533_s8 + $0x78] sm:$0xff] }
  0xdb   :  { %2563 = vperm.xlu0 %3816, %v2441_v50   ;;  %v103_v50 = vld [vmem:[%s5532_s2 + $0x1f0] sm:$0xff] }
  0xdd   :  { %3553 = vmatmul.mubr.msk.f32.gmra.mrb[44].mxu0 %vm752_vm1, %v86_v55  ;;  %v2433_v55 = vld [vmem:[%s5533_s8 + $0x70] sm:$0xff] }
  0xde   :  { %2488 = vperm.xlu1 %3817, %v2426_v56   ;;  %3555 = vmatprep.mubr.msk.f32.mxu0 %vm752_vm1, %v87_v57  ;;  %v4847_v56 = vpop.permute.xlu0 %1536  ;;  %v4850_v57 = vpop.permute.xlu1 %1541 }
  0xdf   :  { %2483 = vperm.xlu0 %3816, %v2425_v59   ;;  %v104_v59 = vld [vmem:[%s5532_s2 + $0x1f8] sm:$0xff] }
  0xe1   :  { %3556 = vmatmul.mubr.msk.f32.gmra.mrb[46].mxu0 %vm752_vm1, %v88_v60  ;;  %v3037_v60 = vld [vmem:[%s5534_s11] sm:$0x3] }
  0xe2   :  { %2578 = vperm.xlu1 %3817, %v2444_v63   ;;  %3558 = vmatprep.mubr.msk.f32.mxu0 %vm752_vm1, %v89_v0  ;;  %v4860_v63 = vpop.permute.xlu0 %1546  ;;  %v1843_v0 = vld [vmem:[%s5535_s5 + $0x8] sm:$0xff] }
  0xe3   :  { %2573 = vperm.xlu0 %3816, %v2443_v5   ;;  %2226 = vmatprep.mubr.f32.mxu1 %v1843_v0 }
  0xe5   :  { %3559 = vmatmul.mubr.msk.f32.gmra.mrb[48].mxu0 %vm752_vm1, %v90_v6 }
  0xe6   :  { %2498 = vperm.xlu1 %3817, %v2428_v7   ;;  %3561 = vmatprep.mubr.msk.f32.mxu0 %vm752_vm1, %v91_v8 }
  0xe7   :  { %2493 = vperm.xlu0 %3816, %v2427_v9  }
  0xe9   :  { %3562 = vmatmul.mubr.msk.f32.gmra.mrb[50].mxu0 %vm752_vm1, %v92_v14 }
  0xea   :  { %2588 = vperm.xlu1 %3817, %v2446_v15   ;;  %3564 = vmatprep.mubr.msk.f32.mxu0 %vm752_vm1, %v93_v16 }
  0xeb   :  { %2583 = vperm.xlu0 %3816, %v2445_v17  }
  0xed   :  { %3565 = vmatmul.mubr.msk.f32.gmra.mrb[52].mxu0 %vm752_vm1, %v94_v18 }
  0xee   :  { %2508 = vperm.xlu1 %3817, %v2430_v22   ;;  %3567 = vmatprep.mubr.msk.f32.mxu0 %vm752_vm1, %v95_v23 }
  0xef   :  { %2503 = vperm.xlu0 %3816, %v2429_v25  }
  0xf1   :  { %3568 = vmatmul.mubr.msk.f32.gmra.mrb[54].mxu0 %vm752_vm1, %v96_v27 }
  0xf2   :  { %2598 = vperm.xlu1 %3817, %v2448_v28   ;;  %3570 = vmatprep.mubr.msk.f32.mxu0 %vm752_vm1, %v97_v30 }
  0xf3   :  { %2593 = vperm.xlu0 %3816, %v2447_v31  }
  0xf5   :  { %3571 = vmatmul.mubr.msk.f32.gmra.mrb[56].mxu0 %vm752_vm1, %v98_v34 }
  0xf6   :  { %2518 = vperm.xlu1 %3817, %v2432_v37   ;;  %3573 = vmatprep.mubr.msk.f32.mxu0 %vm752_vm1, %v99_v38 }
  0xf7   :  { %2513 = vperm.xlu0 %3816, %v2431_v39  }
  0xf9   :  { %3574 = vmatmul.mubr.msk.f32.gmra.mrb[58].mxu0 %vm752_vm1, %v100_v40 }
  0xfa   :  { %2608 = vperm.xlu1 %3817, %v2450_v43   ;;  %3576 = vmatprep.mubr.msk.f32.mxu0 %vm752_vm1, %v101_v44 }
  0xfb   :  { %2603 = vperm.xlu0 %3816, %v2449_v47  }
  0xfd   :  { %3577 = vmatmul.mubr.msk.f32.gmra.mrb[60].mxu0 %vm752_vm1, %v102_v48 }
  0xfe   :  { %2528 = vperm.xlu1 %3817, %v2434_v49   ;;  %3579 = vmatprep.mubr.msk.f32.mxu0 %vm752_vm1, %v103_v50 }
  0xff   :  { %2523 = vperm.xlu0 %3816, %v2433_v55  }
 0x101   :  { %3580 = vmatmul.mubr.msk.f32.gmra.mrb[62].mxu0 %vm752_vm1, %v104_v59 }
 0x103   :  { %3040 = vperm.xlu0 %3816, %v3037_v60  }
 0x158   :  { %v3488_v5 = vpop.f32.mrb[0].mxu0 }
 0x159   :  { %v1715_v6 = vadd.f32 %v3488_v5, %v4519_v58  ;;  %v1011_v7 = vpop.f32.mrb[1].mxu0 }
 0x15a   :  { %v1714_v8 = vadd.f32 %v4496_v51, %v1011_v7 }
 0x15b   :  { %v1779_v9 = vmax.f32 %v1715_v6, 0.0 }
 0x15c   :  { %v1778_v14 = vmax.f32 %v1714_v8, 0.0  ;;  %v3491_v15 = vpop.f32.mrb[2].mxu0 }
 0x15d   :  { %v1717_v16 = vadd.f32 %v3491_v15, %v4527_v61  ;;  %v1021_v17 = vpop.f32.mrb[3].mxu0 }
 0x15e   :  { %v1716_v18 = vadd.f32 %v4499_v52, %v1021_v17  ;;  %v3591_v22 = vpack.c.bf16 %v1779_v9, %v1778_v14 }
 0x15f   :  { %v1781_v23 = vmax.f32 %v1717_v16, 0.0 }
 0x160   :  { %v1780_v25 = vmax.f32 %v1716_v18, 0.0  ;;  %v3494_v27 = vpop.f32.mrb[4].mxu0  ;;  %3592 = vmatpush1.bf16.msra.mxu1 %v3591_v22 }
 0x161   :  { %v1719_v28 = vadd.f32 %v3494_v27, %v4549_v4  ;;  %v1031_v30 = vpop.f32.mrb[5].mxu0  ;;  %3593 = vmatprep.subr.bf16.mxu1 %v3819_v1 }
 0x162   :  { %v3594_v58 = vpack.c.bf16 %v1781_v23, %v1780_v25  ;;  %v1718_v51 = vadd.f32 %v4546_v3, %v1031_v30  ;;  %v4894_v30 = vpop.permute.xlu0 %1556 }
 0x163   :  { %v1783_v31 = vmax.f32 %v1719_v28, 0.0 }
 0x164   :  { %v1782_v34 = vmax.f32 %v1718_v51, 0.0  ;;  %v3497_v37 = vpop.f32.mrb[6].mxu0  ;;  %3595 = vmatpush1.bf16.msra.mxu1 %v3594_v58 }
 0x165   :  { %v1721_v61 = vadd.f32 %v3497_v37, %v4577_v13  ;;  %v1041_v52 = vpop.f32.mrb[7].mxu0  ;;  %3596 = vmatprep.subr.bf16.mxu1 %v3819_v1 }
 0x166   :  { %v3597_v38 = vpack.c.bf16 %v1783_v31, %v1782_v34  ;;  %v1720_v39 = vadd.f32 %v4569_v10, %v1041_v52 }
 0x167   :  { %v1785_v40 = vmax.f32 %v1721_v61, 0.0 }
 0x168   :  { %v1784_v4 = vmax.f32 %v1720_v39, 0.0  ;;  %v3500_v43 = vpop.f32.mrb[8].mxu0  ;;  %3598 = vmatpush1.bf16.msra.mxu1 %v3597_v38 }
 0x169   :  { %v1723_v44 = vadd.f32 %v3500_v43, %v4599_v20  ;;  %v1051_v47 = vpop.f32.mrb[9].mxu0  ;;  %3599 = vmatprep.subr.bf16.mxu1 %v3819_v1 }
 0x16a   :  { %v3600_v3 = vpack.c.bf16 %v1785_v40, %v1784_v4  ;;  %v1722_v48 = vadd.f32 %v4596_v19, %v1051_v47 }
 0x16b   :  { %v1787_v49 = vmax.f32 %v1723_v44, 0.0 }
 0x16c   :  { %v1786_v13 = vmax.f32 %v1722_v48, 0.0  ;;  %v3503_v50 = vpop.f32.mrb[10].mxu0  ;;  %3601 = vmatpush1.bf16.msra.mxu1 %v3600_v3 }
 0x16d   :  { %v1725_v55 = vadd.f32 %v3503_v50, %v4627_v29  ;;  %v1061_v59 = vpop.f32.mrb[11].mxu0  ;;  %3602 = vmatprep.subr.bf16.mxu1 %v3819_v1  ;;  %v4884_v29 = vpop.permute.xlu1 %1551 }
 0x16e   :  { %v3603_v10 = vpack.c.bf16 %v1787_v49, %v1786_v13  ;;  %v1724_v60 = vadd.f32 %v4619_v26, %v1061_v59 }
 0x16f   :  { %v1789_v0 = vmax.f32 %v1725_v55, 0.0 }
 0x170   :  { %v1788_v20 = vmax.f32 %v1724_v60, 0.0  ;;  %v3506_v5 = vpop.f32.mrb[12].mxu0  ;;  %3604 = vmatpush1.bf16.msra.mxu1 %v3603_v10 }
 0x171   :  { %v1727_v6 = vadd.f32 %v3506_v5, %v4649_v36  ;;  %v1071_v7 = vpop.f32.mrb[13].mxu0  ;;  %3605 = vmatprep.subr.bf16.mxu1 %v3819_v1  ;;  %v4891_v27 = vpop.permute.xlu1 %1561 }
 0x172   :  { %v3606_v19 = vpack.c.bf16 %v1789_v0, %v1788_v20  ;;  %v1726_v8 = vadd.f32 %v4646_v35, %v1071_v7 }
 0x173   :  { %v1791_v9 = vmax.f32 %v1727_v6, 0.0 }
 0x174   :  { %v1790_v14 = vmax.f32 %v1726_v8, 0.0  ;;  %v3509_v15 = vpop.f32.mrb[14].mxu0  ;;  %3607 = vmatpush1.bf16.msra.mxu1 %v3606_v19 }
 0x175   :  { %v1729_v26 = vadd.f32 %v3509_v15, %v4677_v45  ;;  %v1081_v16 = vpop.f32.mrb[15].mxu0  ;;  %3608 = vmatprep.subr.bf16.mxu1 %v3819_v1  ;;  %v4899_v52 = vpop.permute.xlu1 %1571 }
 0x176   :  { %v3609_v17 = vpack.c.bf16 %v1791_v9, %v1790_v14  ;;  %v1728_v36 = vadd.f32 %v4669_v42, %v1081_v16 }
 0x177   :  { %v1793_v18 = vmax.f32 %v1729_v26, 0.0 }
 0x178   :  { %v1792_v22 = vmax.f32 %v1728_v36, 0.0  ;;  %v3512_v23 = vpop.f32.mrb[16].mxu0  ;;  %3610 = vmatpush1.bf16.msra.mxu1 %v3609_v17 }
 0x179   :  { %v1731_v35 = vadd.f32 %v3512_v23, %v4699_v54  ;;  %v1091_v25 = vpop.f32.mrb[17].mxu0  ;;  %3611 = vmatprep.subr.bf16.mxu1 %v3819_v1  ;;  %v4908_v49 = vpop.permute.xlu1 %1581 }
 0x17a   :  { %v3612_v28 = vpack.c.bf16 %v1793_v18, %v1792_v22  ;;  %v1730_v45 = vadd.f32 %v4696_v53, %v1091_v25  ;;  %v4901_v53 = vpop.permute.xlu0 %1566 }
 0x17b   :  { %v1795_v58 = vmax.f32 %v1731_v35, 0.0 }
 0x17c   :  { %v1794_v51 = vmax.f32 %v1730_v45, 0.0  ;;  %v3515_v31 = vpop.f32.mrb[18].mxu0  ;;  %3613 = vmatpush1.bf16.msra.mxu1 %v3612_v28 }
 0x17d   :  { %v1733_v42 = vadd.f32 %v3515_v31, %v4728_v2  ;;  %v1101_v34 = vpop.f32.mrb[19].mxu0  ;;  %3614 = vmatprep.subr.bf16.mxu1 %v3819_v1  ;;  %v4916_v5 = vpop.permute.xlu1 %1591 }
 0x17e   :  { %v3615_v54 = vpack.c.bf16 %v1795_v58, %v1794_v51  ;;  %v1732_v37 = vadd.f32 %v4719_v62, %v1101_v34  ;;  %v4911_v50 = vpop.permute.xlu0 %1576 }
 0x17f   :  { %v1797_v61 = vmax.f32 %v1733_v42, 0.0 }
 0x180   :  { %v1796_v38 = vmax.f32 %v1732_v37, 0.0  ;;  %v3518_v39 = vpop.f32.mrb[20].mxu0  ;;  %3616 = vmatpush1.bf16.msra.mxu1 %v3615_v54 }
 0x181   :  { %v1735_v40 = vadd.f32 %v3518_v39, %v4750_v12  ;;  %v1111_v4 = vpop.f32.mrb[21].mxu0  ;;  %3617 = vmatprep.subr.bf16.mxu1 %v3819_v1  ;;  %v4925_v17 = vpop.permute.xlu1 %1601 }
 0x182   :  { %v3618_v2 = vpack.c.bf16 %v1797_v61, %v1796_v38  ;;  %v1734_v43 = vadd.f32 %v4747_v11, %v1111_v4 }
 0x183   :  { %v1799_v44 = vmax.f32 %v1735_v40, 0.0 }
 0x184   :  { %v1798_v47 = vmax.f32 %v1734_v43, 0.0  ;;  %v3521_v3 = vpop.f32.mrb[22].mxu0  ;;  %3619 = vmatpush1.bf16.msra.mxu1 %v3618_v2 }
 0x185   :  { %v1737_v62 = vadd.f32 %v3521_v3, %v4778_v24  ;;  %v1121_v48 = vpop.f32.mrb[23].mxu0  ;;  %3620 = vmatprep.subr.bf16.mxu1 %v3819_v1  ;;  %v4933_v58 = vpop.permute.xlu1 %1611 }
 0x186   :  { %v3621_v13 = vpack.c.bf16 %v1799_v44, %v1798_v47  ;;  %v1736_v12 = vadd.f32 %v4770_v21, %v1121_v48  ;;  %v4918_v21 = vpop.permute.xlu0 %1586 }
 0x187   :  { %v1801_v55 = vmax.f32 %v1737_v62, 0.0 }
 0x188   :  { %v1800_v59 = vmax.f32 %v1736_v12, 0.0  ;;  %v3524_v10 = vpop.f32.mrb[24].mxu0  ;;  %3622 = vmatpush1.bf16.msra.mxu1 %v3621_v13 }
 0x189   :  { %v1739_v11 = vadd.f32 %v3524_v10, %v4800_v33  ;;  %v1131_v60 = vpop.f32.mrb[25].mxu0  ;;  %3623 = vmatprep.subr.bf16.mxu1 %v3819_v1  ;;  %v4948_v4 = vpop.permute.xlu1 %1621 }
 0x18a   :  { %v3624_v24 = vpack.c.bf16 %v1801_v55, %v1800_v59  ;;  %v1738_v0 = vadd.f32 %v4797_v32, %v1131_v60  ;;  %v4928_v18 = vpop.permute.xlu0 %1596 }
 0x18b   :  { %v1803_v20 = vmax.f32 %v1739_v11, 0.0 }
 0x18c   :  { %v1802_v6 = vmax.f32 %v1738_v0, 0.0  ;;  %v3527_v7 = vpop.f32.mrb[26].mxu0  ;;  %3625 = vmatpush1.bf16.msra.mxu1 %v3624_v24 }
 0x18d   :  { %v1741_v19 = vadd.f32 %v3527_v7, %v4828_v46  ;;  %v1141_v8 = vpop.f32.mrb[27].mxu0  ;;  %3626 = vmatprep.subr.bf16.mxu1 %v3819_v1  ;;  %v4962_v59 = vpop.permute.xlu1 %1631 }
 0x18e   :  { %v3627_v33 = vpack.c.bf16 %v1803_v20, %v1802_v6  ;;  %v1740_v9 = vadd.f32 %v4820_v41, %v1141_v8 }
 0x18f   :  { %v1805_v14 = vmax.f32 %v1741_v19, 0.0 }
 0x190   :  { %v1804_v15 = vmax.f32 %v1740_v9, 0.0  ;;  %v3530_v26 = vpop.f32.mrb[28].mxu0  ;;  %3628 = vmatpush1.bf16.msra.mxu1 %v3627_v33 }
 0x191   :  { %v1743_v32 = vadd.f32 %v3530_v26, %v4850_v57  ;;  %v1151_v16 = vpop.f32.mrb[29].mxu0  ;;  %3629 = vmatprep.subr.bf16.mxu1 %v3819_v1 }
 0x192   :  { %v3630_v36 = vpack.c.bf16 %v1805_v14, %v1804_v15  ;;  %v1742_v46 = vadd.f32 %v4847_v56, %v1151_v16  ;;  %v4935_v56 = vpop.permute.xlu0 %1606  ;;  %v1851_v14 = vld [vmem:[%s5535_s5 + $0x48] sm:$0xff] }
 0x193   :  { %v1807_v22 = vmax.f32 %v1743_v32, 0.0 }
 0x194   :  { %v1806_v23 = vmax.f32 %v1742_v46, 0.0  ;;  %v3533_v35 = vpop.f32.mrb[30].mxu0  ;;  %3631 = vmatpush1.bf16.msra.mxu1 %v3630_v36 }
 0x195   :  { %v1745_v41 = vadd.f32 %v3533_v35, %v4884_v29  ;;  %v1161_v25 = vpop.f32.mrb[31].mxu0  ;;  %3632 = vmatprep.subr.bf16.mxu1 %v3819_v1 }
 0x196   :  { %v3633_v57 = vpack.c.bf16 %v1807_v22, %v1806_v23  ;;  %v1744_v28 = vadd.f32 %v4860_v63, %v1161_v25  ;;  %v1842_v63 = vld [vmem:[%s5535_s5] sm:$0xff]  ;;  %v4951_v43 = vpop.permute.xlu0 %1616 }
 0x197   :  { %v1809_v45 = vmax.f32 %v1745_v41, 0.0 }
 0x198   :  { %v1808_v51 = vmax.f32 %v1744_v28, 0.0  ;;  %v3536_v31 = vpop.f32.mrb[32].mxu0  ;;  %3634 = vmatpush1.bf16.msra.mxu1 %v3633_v57 }
 0x199   :  { %v1747_v42 = vadd.f32 %v3536_v31, %v4891_v27  ;;  %v1171_v34 = vpop.f32.mrb[33].mxu0  ;;  %3635 = vmatprep.subr.bf16.mxu1 %v3819_v1  ;;  %v1845_v27 = vld [vmem:[%s5535_s5 + $0x18] sm:$0xff] }
 0x19a   :  { %v3636_v29 = vpack.c.bf16 %v1809_v45, %v1808_v51  ;;  %v1746_v54 = vadd.f32 %v4894_v30, %v1171_v34  ;;  %v4967_v60 = vpop.permute.xlu0 %1626 }
 0x19b   :  { %v1811_v37 = vmax.f32 %v1747_v42, 0.0 }
 0x19c   :  { %v1810_v61 = vmax.f32 %v1746_v54, 0.0  ;;  %v3539_v38 = vpop.f32.mrb[34].mxu0  ;;  %3637 = vmatpush1.bf16.msra.mxu1 %v3636_v29 }
 0x19d   :  { %v1749_v39 = vadd.f32 %v3539_v38, %v4899_v52  ;;  %v1181_v40 = vpop.f32.mrb[35].mxu0  ;;  %3638 = vmatprep.subr.bf16.mxu1 %v3819_v1  ;;  %v1844_v52 = vld [vmem:[%s5535_s5 + $0x10] sm:$0xff]  ;;  %v1854_v38 = vld [vmem:[%s5535_s5 + $0x60] sm:$0xff] }
 0x19e   :  { %v3639_v30 = vpack.c.bf16 %v1811_v37, %v1810_v61  ;;  %v1748_v2 = vadd.f32 %v4901_v53, %v1181_v40  ;;  %v1847_v53 = vld [vmem:[%s5535_s5 + $0x28] sm:$0xff]  ;;  %v1637_v32 = vpop.permute.xlu0 %1636  ;;  %v1857_v40 = vld [vmem:[%s5535_s5 + $0x78] sm:$0xff] }
 0x19f   :  { %v1813_v44 = vmax.f32 %v1749_v39, 0.0  ;;  %2227 = vmatmul.mubr.f32.vlgmr.msra.gmra.mrb[0].mxu1 %v1842_v63 }
 0x1a0   :  { %v1812_v47 = vmax.f32 %v1748_v2, 0.0  ;;  %v3542_v3 = vpop.f32.mrb[36].mxu0  ;;  %3640 = vmatpush1.bf16.msra.mxu1 %v3639_v30  ;;  %2231 = vmatprep.mubr.f32.mxu1 %v1845_v27 }
 0x1a1   :  { %v1751_v62 = vadd.f32 %v3542_v3, %v4908_v49  ;;  %v1191_v48 = vpop.f32.mrb[37].mxu0  ;;  %3641 = vmatprep.subr.bf16.mxu1 %v3819_v1  ;;  %v1846_v49 = vld [vmem:[%s5535_s5 + $0x20] sm:$0xff]  ;;  %v1856_v3 = vld [vmem:[%s5535_s5 + $0x70] sm:$0xff] }
 0x1a2   :  { %v3642_v13 = vpack.c.bf16 %v1813_v44, %v1812_v47  ;;  %v1750_v12 = vadd.f32 %v4911_v50, %v1191_v48  ;;  %v1849_v50 = vld [vmem:[%s5535_s5 + $0x38] sm:$0xff]  ;;  %v1647_v51 = vpop.permute.xlu0 %1646  ;;  %v1859_v48 = vld [vmem:[%s5535_s5 + $0x88] sm:$0xff] }
 0x1a3   :  { %v1815_v55 = vmax.f32 %v1751_v62, 0.0  ;;  %2232 = vmatmul.mubr.f32.gmra.mrb[2].mxu1 %v1844_v52 }
 0x1a4   :  { %v1814_v10 = vmax.f32 %v1750_v12, 0.0  ;;  %v3545_v11 = vpop.f32.mrb[38].mxu0  ;;  %3643 = vmatpush1.bf16.msra.mxu1 %v3642_v13  ;;  %2236 = vmatprep.mubr.f32.mxu1 %v1847_v53 }
 0x1a5   :  { %v1753_v24 = vadd.f32 %v3545_v11, %v4916_v5  ;;  %v1201_v0 = vpop.f32.mrb[39].mxu0  ;;  %3644 = vmatprep.subr.bf16.mxu1 %v3819_v1  ;;  %v1848_v5 = vld [vmem:[%s5535_s5 + $0x30] sm:$0xff]  ;;  %v1858_v11 = vld [vmem:[%s5535_s5 + $0x80] sm:$0xff] }
 0x1a6   :  { %v3645_v20 = vpack.c.bf16 %v1815_v55, %v1814_v10  ;;  %v1752_v6 = vadd.f32 %v4918_v21, %v1201_v0  ;;  %v1642_v21 = vpop.permute.xlu1 %1641  ;;  %v1657_v2 = vpop.permute.xlu0 %1656  ;;  %v1861_v0 = vld [vmem:[%s5535_s5 + $0x98] sm:$0xff] }
 0x1a7   :  { %v1817_v7 = vmax.f32 %v1753_v24, 0.0  ;;  %2237 = vmatmul.mubr.f32.gmra.mrb[4].mxu1 %v1846_v49 }
 0x1a8   :  { %v1816_v19 = vmax.f32 %v1752_v6, 0.0  ;;  %v3548_v8 = vpop.f32.mrb[40].mxu0  ;;  %3646 = vmatpush1.bf16.msra.mxu1 %v3645_v20  ;;  %2241 = vmatprep.mubr.f32.mxu1 %v1849_v50 }
 0x1a9   :  { %v1755_v33 = vadd.f32 %v3548_v8, %v4925_v17  ;;  %v1211_v9 = vpop.f32.mrb[41].mxu0  ;;  %3647 = vmatprep.subr.bf16.mxu1 %v3819_v1  ;;  %v1850_v17 = vld [vmem:[%s5535_s5 + $0x40] sm:$0xff]  ;;  %v1860_v8 = vld [vmem:[%s5535_s5 + $0x90] sm:$0xff] }
 0x1aa   :  { %v3648_v15 = vpack.c.bf16 %v1817_v7, %v1816_v19  ;;  %v1754_v26 = vadd.f32 %v4928_v18, %v1211_v9  ;;  %v1853_v18 = vld [vmem:[%s5535_s5 + $0x58] sm:$0xff]  ;;  %v1652_v57 = vpop.permute.xlu1 %1651  ;;  %v1667_v49 = vpop.permute.xlu0 %1666  ;;  %v1863_v9 = vld [vmem:[%s5535_s5 + $0xa8] sm:$0xff] }
 0x1ab   :  { %v1819_v16 = vmax.f32 %v1755_v33, 0.0  ;;  %2242 = vmatmul.mubr.f32.gmra.mrb[6].mxu1 %v1848_v5 }
 0x1ac   :  { %v1818_v36 = vmax.f32 %v1754_v26, 0.0  ;;  %v3551_v46 = vpop.f32.mrb[42].mxu0  ;;  %3649 = vmatpush1.bf16.msra.mxu1 %v3648_v15  ;;  %2246 = vmatprep.mubr.f32.mxu1 %v1851_v14 }
 0x1ad   :  { %v1757_v22 = vadd.f32 %v3551_v46, %v4933_v58  ;;  %v1221_v23 = vpop.f32.mrb[43].mxu0  ;;  %3650 = vmatprep.subr.bf16.mxu1 %v3819_v1  ;;  %v1852_v58 = vld [vmem:[%s5535_s5 + $0x50] sm:$0xff]  ;;  %v1862_v46 = vld [vmem:[%s5535_s5 + $0xa0] sm:$0xff] }
 0x1ae   :  { %v3651_v35 = vpack.c.bf16 %v1819_v16, %v1818_v36  ;;  %v1756_v41 = vadd.f32 %v4935_v56, %v1221_v23  ;;  %v1855_v56 = vld [vmem:[%s5535_s5 + $0x68] sm:$0xff]  ;;  %v1662_v27 = vpop.permute.xlu1 %1661  ;;  %v1677_v26 = vpop.permute.xlu0 %1676  ;;  %v1865_v23 = vld [vmem:[%s5535_s5 + $0xb8] sm:$0xff] }
 0x1af   :  { %v1821_v25 = vmax.f32 %v1757_v22, 0.0  ;;  %2247 = vmatmul.mubr.f32.gmra.mrb[8].mxu1 %v1850_v17 }
 0x1b0   :  { %v1820_v28 = vmax.f32 %v1756_v41, 0.0  ;;  %v3554_v45 = vpop.f32.mrb[44].mxu0  ;;  %3652 = vmatpush1.bf16.msra.mxu1 %v3651_v35  ;;  %2251 = vmatprep.mubr.f32.mxu1 %v1853_v18 }
 0x1b1   :  { %v1759_v31 = vadd.f32 %v3554_v45, %v4948_v4  ;;  %v1231_v42 = vpop.f32.mrb[45].mxu0  ;;  %3653 = vmatprep.subr.bf16.mxu1 %v3819_v1  ;;  %v1864_v45 = vld [vmem:[%s5535_s5 + $0xb0] sm:$0xff] }
 0x1b2   :  { %v3654_v34 = vpack.c.bf16 %v1821_v25, %v1820_v28  ;;  %v1758_v29 = vadd.f32 %v4951_v43, %v1231_v42  ;;  %v1672_v55 = vpop.permute.xlu1 %1671  ;;  %v1867_v42 = vld [vmem:[%s5535_s5 + $0xc8] sm:$0xff] }
 0x1b3   :  { %v1823_v54 = vmax.f32 %v1759_v31, 0.0  ;;  %2252 = vmatmul.mubr.f32.gmra.mrb[10].mxu1 %v1852_v58  ;;  %v1687_v58 = vpop.permute.xlu0 %1686 }
 0x1b4   :  { %v1822_v37 = vmax.f32 %v1758_v29, 0.0  ;;  %v3557_v61 = vpop.f32.mrb[46].mxu0  ;;  %3655 = vmatpush1.bf16.msra.mxu1 %v3654_v34  ;;  %2256 = vmatprep.mubr.f32.mxu1 %v1855_v56 }
 0x1b5   :  { %v1761_v63 = vadd.f32 %v3557_v61, %v4962_v59  ;;  %v1241_v39 = vpop.f32.mrb[47].mxu0  ;;  %3656 = vmatprep.subr.bf16.mxu1 %v3819_v1  ;;  %v1866_v61 = vld [vmem:[%s5535_s5 + $0xc0] sm:$0xff] }
 0x1b6   :  { %v3657_v4 = vpack.c.bf16 %v1823_v54, %v1822_v37  ;;  %v1760_v30 = vadd.f32 %v4967_v60, %v1241_v39  ;;  %v1682_v14 = vpop.permute.xlu1 %1681  ;;  %v1869_v39 = vld [vmem:[%s5535_s5 + $0xd8] sm:$0xff] }
 0x1b7   :  { %v1825_v43 = vmax.f32 %v1761_v63, 0.0  ;;  %2257 = vmatmul.mubr.f32.gmra.mrb[12].mxu1 %v1854_v38 }
 0x1b8   :  { %v1824_v44 = vmax.f32 %v1760_v30, 0.0  ;;  %v3560_v47 = vpop.f32.mrb[48].mxu0  ;;  %3658 = vmatpush1.bf16.msra.mxu1 %v3657_v4  ;;  %2261 = vmatprep.mubr.f32.mxu1 %v1857_v40  ;;  %v1697_v30 = vpop.permute.xlu0 %1696 }
 0x1b9   :  { %v1763_v52 = vadd.f32 %v3560_v47, %v1642_v21  ;;  %v1251_v62 = vpop.f32.mrb[49].mxu0  ;;  %3659 = vmatprep.subr.bf16.mxu1 %v3819_v1  ;;  %v1868_v47 = vld [vmem:[%s5535_s5 + $0xd0] sm:$0xff] }
 0x1ba   :  { %v3660_v53 = vpack.c.bf16 %v1825_v43, %v1824_v44  ;;  %v1762_v13 = vadd.f32 %v1637_v32, %v1251_v62  ;;  %v1692_v25 = vpop.permute.xlu1 %1691  ;;  %v1871_v62 = vld [vmem:[%s5535_s5 + $0xe8] sm:$0xff] }
 0x1bb   :  { %v1827_v12 = vmax.f32 %v1763_v52, 0.0  ;;  %2262 = vmatmul.mubr.f32.gmra.mrb[14].mxu1 %v1856_v3 }
 0x1bc   :  { %v1826_v59 = vmax.f32 %v1762_v13, 0.0  ;;  %v3563_v10 = vpop.f32.mrb[50].mxu0  ;;  %3661 = vmatpush1.bf16.msra.mxu1 %v3660_v53  ;;  %2266 = vmatprep.mubr.f32.mxu1 %v1859_v48 }
 0x1bd   :  { %v1765_v60 = vadd.f32 %v3563_v10, %v1652_v57  ;;  %v1261_v24 = vpop.f32.mrb[51].mxu0  ;;  %3662 = vmatprep.subr.bf16.mxu1 %v3819_v1  ;;  %v1870_v10 = vld [vmem:[%s5535_s5 + $0xe0] sm:$0xff] }
 0x1be   :  { %v3663_v50 = vpack.c.bf16 %v1827_v12, %v1826_v59  ;;  %v1764_v20 = vadd.f32 %v1647_v51, %v1261_v24  ;;  %v1702_v40 = vpop.permute.xlu1 %1701  ;;  %v1873_v24 = vld [vmem:[%s5535_s5 + $0xf8] sm:$0xff] }
 0x1bf   :  { %v1829_v6 = vmax.f32 %v1765_v60, 0.0  ;;  %2267 = vmatmul.mubr.f32.gmra.mrb[16].mxu1 %v1858_v11  ;;  %v1707_v11 = vpop.permute.xlu0 %1706 }
 0x1c0   :  { %v1828_v7 = vmax.f32 %v1764_v20, 0.0  ;;  %v3566_v19 = vpop.f32.mrb[52].mxu0  ;;  %3664 = vmatpush1.bf16.msra.mxu1 %v3663_v50  ;;  %2271 = vmatprep.mubr.f32.mxu1 %v1861_v0 }
 0x1c1   :  { %v1767_v5 = vadd.f32 %v3566_v19, %v1662_v27  ;;  %v1271_v33 = vpop.f32.mrb[53].mxu0  ;;  %3665 = vmatprep.subr.bf16.mxu1 %v3819_v1  ;;  %v1875_v19 = vld [vmem:[%s5535_s5 + $0x108] sm:$0xff] }
 0x1c2   :  { %v3666_v21 = vpack.c.bf16 %v1829_v6, %v1828_v7  ;;  %v1766_v15 = vadd.f32 %v1657_v2, %v1271_v33  ;;  %v1712_v12 = vpop.permute.xlu1 %1711  ;;  %v1872_v7 = vld [vmem:[%s5535_s5 + $0xf0] sm:$0xff]  ;;  %v1877_v33 = vld [vmem:[%s5535_s5 + $0x118] sm:$0xff] }
 0x1c3   :  { %v1831_v32 = vmax.f32 %v1767_v5, 0.0  ;;  %2272 = vmatmul.mubr.f32.gmra.mrb[18].mxu1 %v1860_v8  ;;  %v1874_v5 = vld [vmem:[%s5535_s5 + $0x100] sm:$0xff] }
 0x1c4   :  { %v1830_v16 = vmax.f32 %v1766_v15, 0.0  ;;  %v3569_v36 = vpop.f32.mrb[54].mxu0  ;;  %3667 = vmatpush1.bf16.msra.mxu1 %v3666_v21  ;;  %2276 = vmatprep.mubr.f32.mxu1 %v1863_v9  ;;  %v1879_v9 = vld [vmem:[%s5535_s5 + $0x128] sm:$0xff]  ;;  %v1881_v21 = vld [vmem:[%s5535_s5 + $0x138] sm:$0xff]  ;;  %v1880_v15 = vld [vmem:[%s5535_s5 + $0x130] sm:$0xff] }
 0x1c5   :  { %v1769_v17 = vadd.f32 %v3569_v36, %v1672_v55  ;;  %v1281_v22 = vpop.f32.mrb[55].mxu0  ;;  %3668 = vmatprep.subr.bf16.mxu1 %v3819_v1  ;;  %v1884_v36 = vld [vmem:[%s5535_s5 + $0x150] sm:$0xff] }
 0x1c6   :  { %v3669_v18 = vpack.c.bf16 %v1831_v32, %v1830_v16  ;;  %v1768_v35 = vadd.f32 %v1667_v49, %v1281_v22  ;;  %v1882_v32 = vld [vmem:[%s5535_s5 + $0x140] sm:$0xff]  ;;  %v1885_v16 = vld [vmem:[%s5535_s5 + $0x158] sm:$0xff] }
 0x1c7   :  { %v1833_v41 = vmax.f32 %v1769_v17, 0.0  ;;  %2277 = vmatmul.mubr.f32.gmra.mrb[20].mxu1 %v1862_v46  ;;  %v1887_v46 = vld [vmem:[%s5535_s5 + $0x168] sm:$0xff]  ;;  %v1886_v17 = vld [vmem:[%s5535_s5 + $0x160] sm:$0xff]  ;;  %v1889_v22 = vld [vmem:[%s5535_s5 + $0x178] sm:$0xff] }
 0x1c8   :  { %v1832_v57 = vmax.f32 %v1768_v35, 0.0  ;;  %v3572_v28 = vpop.f32.mrb[56].mxu0  ;;  %3670 = vmatpush1.bf16.msra.mxu1 %v3669_v18  ;;  %2281 = vmatprep.mubr.f32.mxu1 %v1865_v23  ;;  %v1888_v23 = vld [vmem:[%s5535_s5 + $0x170] sm:$0xff]  ;;  %v1891_v18 = vld [vmem:[%s5535_s5 + $0x188] sm:$0xff]  ;;  %v1890_v35 = vld [vmem:[%s5535_s5 + $0x180] sm:$0xff] }
 0x1c9   :  { %v1771_v51 = vadd.f32 %v3572_v28, %v1682_v14  ;;  %v1291_v31 = vpop.f32.mrb[57].mxu0  ;;  %3671 = vmatprep.subr.bf16.mxu1 %v3819_v1  ;;  %v1878_v14 = vld [vmem:[%s5535_s5 + $0x120] sm:$0xff] }
 0x1ca   :  { %v3672_v56 = vpack.c.bf16 %v1833_v41, %v1832_v57  ;;  %v1770_v34 = vadd.f32 %v1677_v26, %v1291_v31  ;;  %v1883_v26 = vld [vmem:[%s5535_s5 + $0x148] sm:$0xff]  ;;  %v1893_v41 = vld [vmem:[%s5535_s5 + $0x198] sm:$0xff]  ;;  %v1894_v28 = vld [vmem:[%s5535_s5 + $0x1a0] sm:$0xff] }
 0x1cb   :  { %v1835_v29 = vmax.f32 %v1771_v51, 0.0  ;;  %2282 = vmatmul.mubr.f32.gmra.mrb[22].mxu1 %v1864_v45  ;;  %v1895_v57 = vld [vmem:[%s5535_s5 + $0x1a8] sm:$0xff]  ;;  %v1897_v45 = vld [vmem:[%s5535_s5 + $0x1b8] sm:$0xff]  ;;  %v1898_v31 = vld [vmem:[%s5535_s5 + $0x1c0] sm:$0xff] }
 0x1cc   :  { %v1834_v54 = vmax.f32 %v1770_v34, 0.0  ;;  %v3575_v37 = vpop.f32.mrb[58].mxu0  ;;  %3673 = vmatpush1.bf16.msra.mxu1 %v3672_v56  ;;  %2286 = vmatprep.mubr.f32.mxu1 %v1867_v42  ;;  %v1899_v51 = vld [vmem:[%s5535_s5 + $0x1c8] sm:$0xff]  ;;  %v1901_v42 = vld [vmem:[%s5535_s5 + $0x1d8] sm:$0xff]  ;;  %v1900_v56 = vld [vmem:[%s5535_s5 + $0x1d0] sm:$0xff] }
 0x1cd   :  { %v1773_v38 = vadd.f32 %v3575_v37, %v1692_v25  ;;  %v1301_v63 = vpop.f32.mrb[59].mxu0  ;;  %3674 = vmatprep.subr.bf16.mxu1 %v3819_v1  ;;  %v1892_v25 = vld [vmem:[%s5535_s5 + $0x190] sm:$0xff]  ;;  %v1903_v34 = vld [vmem:[%s5535_s5 + $0x1e8] sm:$0xff] }
 0x1ce   :  { %v3675_v27 = vpack.c.bf16 %v1835_v29, %v1834_v54  ;;  %v1772_v4 = vadd.f32 %v1687_v58, %v1301_v63  ;;  %v1896_v58 = vld [vmem:[%s5535_s5 + $0x1b0] sm:$0xff]  ;;  %v1902_v29 = vld [vmem:[%s5535_s5 + $0x1e0] sm:$0xff]  ;;  %v1905_v54 = vld [vmem:[%s5535_s5 + $0x1f8] sm:$0xff] }
 0x1cf   :  { %v1837_v2 = vmax.f32 %v1773_v38, 0.0  ;;  %2287 = vmatmul.mubr.f32.gmra.mrb[24].mxu1 %v1866_v61  ;;  %v1904_v37 = vld [vmem:[%s5535_s5 + $0x1f0] sm:$0xff]  ;;  %v1907_v61 = vld [vmem:[%s5536_s7 + $0x8] sm:$0xff]  ;;  %v1906_v38 = vld [vmem:[%s5536_s7] sm:$0xff] }
 0x1d0   :  { %v1836_v43 = vmax.f32 %v1772_v4, 0.0  ;;  %v3578_v44 = vpop.f32.mrb[60].mxu0  ;;  %3676 = vmatpush1.bf16.msra.mxu1 %v3675_v27  ;;  %2291 = vmatprep.mubr.f32.mxu1 %v1869_v39  ;;  %v1909_v63 = vld [vmem:[%s5536_s7 + $0x18] sm:$0xff]  ;;  %v1908_v39 = vld [vmem:[%s5536_s7 + $0x10] sm:$0xff]  ;;  %v1910_v27 = vld [vmem:[%s5536_s7 + $0x20] sm:$0xff] }
 0x1d1   :  { %v1775_v3 = vadd.f32 %v3578_v44, %v1702_v40  ;;  %v1311_v52 = vpop.f32.mrb[61].mxu0  ;;  %3677 = vmatprep.subr.bf16.mxu1 %v3819_v1  ;;  %v1911_v40 = vld [vmem:[%s5536_s7 + $0x28] sm:$0xff]  ;;  %v1913_v4 = vld [vmem:[%s5536_s7 + $0x38] sm:$0xff] }
 0x1d2   :  { %v3678_v48 = vpack.c.bf16 %v1837_v2, %v1836_v43  ;;  %v1774_v53 = vadd.f32 %v1697_v30, %v1311_v52  ;;  %v1912_v30 = vld [vmem:[%s5536_s7 + $0x30] sm:$0xff]  ;;  %v1915_v2 = vld [vmem:[%s5536_s7 + $0x48] sm:$0xff]  ;;  %v1914_v43 = vld [vmem:[%s5536_s7 + $0x40] sm:$0xff] }
 0x1d3   :  { %v1839_v13 = vmax.f32 %v1775_v3, 0.0  ;;  %2292 = vmatmul.mubr.f32.gmra.mrb[26].mxu1 %v1868_v47  ;;  %v1917_v44 = vld [vmem:[%s5536_s7 + $0x58] sm:$0xff]  ;;  %v1916_v47 = vld [vmem:[%s5536_s7 + $0x50] sm:$0xff]  ;;  %v1919_v3 = vld [vmem:[%s5536_s7 + $0x68] sm:$0xff] }
 0x1d4   :  { %v1838_v55 = vmax.f32 %v1774_v53, 0.0  ;;  %v3581_v59 = vpop.f32.mrb[62].mxu0  ;;  %3679 = vmatpush1.bf16.msra.mxu1 %v3678_v48  ;;  %2296 = vmatprep.mubr.f32.mxu1 %v1871_v62  ;;  %v1918_v52 = vld [vmem:[%s5536_s7 + $0x60] sm:$0xff]  ;;  %v1921_v62 = vld [vmem:[%s5536_s7 + $0x78] sm:$0xff]  ;;  %v1920_v48 = vld [vmem:[%s5536_s7 + $0x70] sm:$0xff] }
 0x1d5   :  { %v1777_v49 = vadd.f32 %v3581_v59, %v1712_v12  ;;  %v1321_v60 = vpop.f32.mrb[63].mxu0  ;;  %3680 = vmatprep.subr.bf16.mxu1 %v3819_v1  ;;  %v1923_v53 = vld [vmem:[%s5536_s7 + $0x88] sm:$0xff]  ;;  %v1925_v12 = vld [vmem:[%s5536_s7 + $0x98] sm:$0xff] }
 0x1d6   :  { %v3681_v0 = vpack.c.bf16 %v1839_v13, %v1838_v55  ;;  %v1776_v50 = vadd.f32 %v1707_v11, %v1321_v60  ;;  %v1922_v13 = vld [vmem:[%s5536_s7 + $0x80] sm:$0xff]  ;;  %v1924_v55 = vld [vmem:[%s5536_s7 + $0x90] sm:$0xff]  ;;  %v1927_v59 = vld [vmem:[%s5536_s7 + $0xa8] sm:$0xff] }
 0x1d7   :  { %v1841_v20 = vmax.f32 %v1777_v49, 0.0  ;;  %2297 = vmatmul.mubr.f32.gmra.mrb[28].mxu1 %v1870_v10  ;;  %v1926_v10 = vld [vmem:[%s5536_s7 + $0xa0] sm:$0xff]  ;;  %v1929_v11 = vld [vmem:[%s5536_s7 + $0xb8] sm:$0xff]  ;;  %v1928_v49 = vld [vmem:[%s5536_s7 + $0xb0] sm:$0xff] }
 0x1d8   :  { %v1840_v6 = vmax.f32 %v1776_v50, 0.0  ;;  %3682 = vmatpush1.bf16.msra.mxu1 %v3681_v0  ;;  %2301 = vmatprep.mubr.f32.mxu1 %v1873_v24  ;;  %v1931_v60 = vld [vmem:[%s5536_s7 + $0xc8] sm:$0xff]  ;;  %v1930_v24 = vld [vmem:[%s5536_s7 + $0xc0] sm:$0xff]  ;;  %v1933_v0 = vld [vmem:[%s5536_s7 + $0xd8] sm:$0xff] }
 0x1d9   :  { %3683 = vmatprep.subr.bf16.mxu1 %v3819_v1  ;;  %v1876_v1 = vld [vmem:[%s5535_s5 + $0x110] sm:$0xff] }
 0x1da   :  { %v3684_v8 = vpack.c.bf16 %v1841_v20, %v1840_v6  ;;  %v1932_v50 = vld [vmem:[%s5536_s7 + $0xd0] sm:$0xff]  ;;  %v1935_v20 = vld [vmem:[%s5536_s7 + $0xe8] sm:$0xff]  ;;  %v5254_v6 = vpop.permute.xlu0 %2084 }
 0x1db   :  { %2302 = vmatmul.mubr.f32.gmra.mrb[30].mxu1 %v1872_v7  ;;  %v5256_v7 = vpop.permute.xlu1 %2089 }
 0x1dc   :  { %3685 = vmatpush1.bf16.msra.mxu1 %v3684_v8  ;;  %2306 = vmatprep.mubr.f32.mxu1 %v1875_v19  ;;  %v1934_v19 = vld [vmem:[%s5536_s7 + $0xe0] sm:$0xff]  ;;  %v1937_v8 = vld [vmem:[%s5536_s7 + $0xf8] sm:$0xff] }
 0x1df   :  { %2307 = vmatmul.mubr.f32.gmra.mrb[32].mxu1 %v1874_v5  ;;  %v2005_v5 = vpop.permute.xlu0 %2004 }
 0x1e0   :  { %2311 = vmatprep.mubr.f32.mxu1 %v1877_v33  ;;  %v1936_v33 = vld [vmem:[%s5536_s7 + $0xf0] sm:$0xff] }
 0x1e3   :  { %2312 = vmatmul.mubr.f32.gmra.mrb[34].mxu1 %v1876_v1  ;;  %v1939_v1 = vld [vmem:[%s5536_s7 + $0x108] sm:$0xff] }
 0x1e4   :  { %2316 = vmatprep.mubr.f32.mxu1 %v1879_v9  ;;  %v2010_v9 = vpop.permute.xlu1 %2009 }
 0x1e7   :  { %2317 = vmatmul.mubr.f32.gmra.mrb[36].mxu1 %v1878_v14  ;;  %v1938_v14 = vld [vmem:[%s5536_s7 + $0x100] sm:$0xff] }
 0x1e8   :  { %2321 = vmatprep.mubr.f32.mxu1 %v1881_v21  ;;  %v1941_v21 = vld [vmem:[%s5536_s7 + $0x118] sm:$0xff] }
 0x1eb   :  { %2322 = vmatmul.mubr.f32.gmra.mrb[38].mxu1 %v1880_v15  ;;  %v5276_v15 = vpop.permute.xlu0 %2094 }
 0x1ec   :  { %2326 = vmatprep.mubr.f32.mxu1 %v1883_v26  ;;  %v5278_v26 = vpop.permute.xlu1 %2099 }
 0x1ef   :  { %2327 = vmatmul.mubr.f32.gmra.mrb[40].mxu1 %v1882_v32  ;;  %v1940_v32 = vld [vmem:[%s5536_s7 + $0x110] sm:$0xff] }
 0x1f0   :  { %2331 = vmatprep.mubr.f32.mxu1 %v1885_v16  ;;  %v1943_v16 = vld [vmem:[%s5536_s7 + $0x128] sm:$0xff] }
 0x1f3   :  { %2332 = vmatmul.mubr.f32.gmra.mrb[42].mxu1 %v1884_v36  ;;  %v2015_v36 = vpop.permute.xlu0 %2014 }
 0x1f4   :  { %2336 = vmatprep.mubr.f32.mxu1 %v1887_v46  ;;  %v1942_v46 = vld [vmem:[%s5536_s7 + $0x120] sm:$0xff] }
 0x1f7   :  { %2337 = vmatmul.mubr.f32.gmra.mrb[44].mxu1 %v1886_v17  ;;  %v1945_v17 = vld [vmem:[%s5536_s7 + $0x138] sm:$0xff] }
 0x1f8   :  { %2341 = vmatprep.mubr.f32.mxu1 %v1889_v22  ;;  %v2020_v22 = vpop.permute.xlu1 %2019 }
 0x1fb   :  { %2342 = vmatmul.mubr.f32.gmra.mrb[46].mxu1 %v1888_v23  ;;  %v1944_v23 = vld [vmem:[%s5536_s7 + $0x130] sm:$0xff] }
 0x1fc   :  { %2346 = vmatprep.mubr.f32.mxu1 %v1891_v18  ;;  %v1947_v18 = vld [vmem:[%s5536_s7 + $0x148] sm:$0xff] }
 0x1ff   :  { %2347 = vmatmul.mubr.f32.gmra.mrb[48].mxu1 %v1890_v35  ;;  %v5298_v35 = vpop.permute.xlu0 %2104 }
 0x200   :  { %2351 = vmatprep.mubr.f32.mxu1 %v1893_v41  ;;  %v5300_v41 = vpop.permute.xlu1 %2109 }
 0x203   :  { %2352 = vmatmul.mubr.f32.gmra.mrb[50].mxu1 %v1892_v25  ;;  %v1946_v25 = vld [vmem:[%s5536_s7 + $0x140] sm:$0xff] }
 0x204   :  { %2356 = vmatprep.mubr.f32.mxu1 %v1895_v57  ;;  %v1949_v57 = vld [vmem:[%s5536_s7 + $0x158] sm:$0xff] }
 0x207   :  { %2357 = vmatmul.mubr.f32.gmra.mrb[52].mxu1 %v1894_v28  ;;  %v2025_v28 = vpop.permute.xlu0 %2024 }
 0x208   :  { %2361 = vmatprep.mubr.f32.mxu1 %v1897_v45  ;;  %v1948_v45 = vld [vmem:[%s5536_s7 + $0x150] sm:$0xff] }
 0x20b   :  { %2362 = vmatmul.mubr.f32.gmra.mrb[54].mxu1 %v1896_v58  ;;  %v1951_v58 = vld [vmem:[%s5536_s7 + $0x168] sm:$0xff] }
 0x20c   :  { %2366 = vmatprep.mubr.f32.mxu1 %v1899_v51  ;;  %v2030_v51 = vpop.permute.xlu1 %2029 }
 0x20f   :  { %2367 = vmatmul.mubr.f32.gmra.mrb[56].mxu1 %v1898_v31 }
 0x210   :  { %2371 = vmatprep.mubr.f32.mxu1 %v1901_v42 }
 0x213   :  { %2372 = vmatmul.mubr.f32.gmra.mrb[58].mxu1 %v1900_v56  ;;  %v1950_v56 = vld [vmem:[%s5536_s7 + $0x160] sm:$0xff] }
 0x214   :  { %2376 = vmatprep.mubr.f32.mxu1 %v1903_v34 }
 0x217   :  { %2377 = vmatmul.mubr.f32.gmra.mrb[60].mxu1 %v1902_v29  ;;  %v1953_v29 = vld [vmem:[%s5536_s7 + $0x178] sm:$0xff] }
 0x218   :  { %2381 = vmatprep.mubr.f32.mxu1 %v1905_v54  ;;  %v5320_v54 = vpop.permute.xlu0 %2114 }
 0x21b   :  { %2382 = vmatmul.mubr.f32.gmra.mrb[62].mxu1 %v1904_v37 }
 0x21c   :  { %2675 = vmatprep.mubr.f32.mxu1 %v1907_v61 }
 0x21f   :  { %2676 = vmatmul.mubr.f32.vlgmr.msra.gmra.mrb[64].mxu1 %v1906_v38 }
 0x220   :  { %2680 = vmatprep.mubr.f32.mxu1 %v1909_v63  ;;  %v5322_v63 = vpop.permute.xlu1 %2119 }
 0x223   :  { %2681 = vmatmul.mubr.f32.gmra.mrb[66].mxu1 %v1908_v39  ;;  %v1952_v39 = vld [vmem:[%s5536_s7 + $0x170] sm:$0xff] }
 0x224   :  { %2685 = vmatprep.mubr.f32.mxu1 %v1911_v40 }
 0x227   :  { %2686 = vmatmul.mubr.f32.gmra.mrb[68].mxu1 %v1910_v27 }
 0x228   :  { %2690 = vmatprep.mubr.f32.mxu1 %v1913_v4  ;;  %v1955_v4 = vld [vmem:[%s5536_s7 + $0x188] sm:$0xff] }
 0x22b   :  { %2691 = vmatmul.mubr.f32.gmra.mrb[70].mxu1 %v1912_v30 }
 0x22c   :  { %2695 = vmatprep.mubr.f32.mxu1 %v1915_v2 }
 0x22f   :  { %2696 = vmatmul.mubr.f32.gmra.mrb[72].mxu1 %v1914_v43 }
 0x230   :  { %2700 = vmatprep.mubr.f32.mxu1 %v1917_v44  ;;  %v2035_v44 = vpop.permute.xlu0 %2034 }
 0x233   :  { %2701 = vmatmul.mubr.f32.gmra.mrb[74].mxu1 %v1916_v47  ;;  %v1954_v47 = vld [vmem:[%s5536_s7 + $0x180] sm:$0xff] }
 0x234   :  { %2705 = vmatprep.mubr.f32.mxu1 %v1919_v3 }
 0x237   :  { %2706 = vmatmul.mubr.f32.gmra.mrb[76].mxu1 %v1918_v52  ;;  %v1957_v52 = vld [vmem:[%s5536_s7 + $0x198] sm:$0xff] }
 0x238   :  { %2710 = vmatprep.mubr.f32.mxu1 %v1921_v62  ;;  %v2040_v62 = vpop.permute.xlu1 %2039 }
 0x23b   :  { %2711 = vmatmul.mubr.f32.gmra.mrb[78].mxu1 %v1920_v48 }
 0x23c   :  { %2715 = vmatprep.mubr.f32.mxu1 %v1923_v53 }
 0x23f   :  { %2716 = vmatmul.mubr.f32.gmra.mrb[80].mxu1 %v1922_v13 }
 0x240   :  { %2720 = vmatprep.mubr.f32.mxu1 %v1925_v12  ;;  %v1956_v12 = vld [vmem:[%s5536_s7 + $0x190] sm:$0xff] }
 0x243   :  { %2721 = vmatmul.mubr.f32.gmra.mrb[82].mxu1 %v1924_v55 }
 0x244   :  { %2725 = vmatprep.mubr.f32.mxu1 %v1927_v59 }
 0x247   :  { %2726 = vmatmul.mubr.f32.gmra.mrb[84].mxu1 %v1926_v10  ;;  %v1959_v10 = vld [vmem:[%s5536_s7 + $0x1a8] sm:$0xff] }
 0x248   :  { %2730 = vmatprep.mubr.f32.mxu1 %v1929_v11  ;;  %v5344_v11 = vpop.permute.xlu0 %2124 }
 0x24b   :  { %2731 = vmatmul.mubr.f32.gmra.mrb[86].mxu1 %v1928_v49 }
 0x24c   :  { %2735 = vmatprep.mubr.f32.mxu1 %v1931_v60 }
 0x24f   :  { %2736 = vmatmul.mubr.f32.gmra.mrb[88].mxu1 %v1930_v24 }
 0x250   :  { %2740 = vmatprep.mubr.f32.mxu1 %v1933_v0  ;;  %v5348_v0 = vpop.permute.xlu1 %2129 }
 0x253   :  { %2741 = vmatmul.mubr.f32.gmra.mrb[90].mxu1 %v1932_v50  ;;  %v1958_v50 = vld [vmem:[%s5536_s7 + $0x1a0] sm:$0xff] }
 0x254   :  { %2745 = vmatprep.mubr.f32.mxu1 %v1935_v20 }
 0x257   :  { %2746 = vmatmul.mubr.f32.gmra.mrb[92].mxu1 %v1934_v19  ;;  %v1961_v19 = vld [vmem:[%s5536_s7 + $0x1b8] sm:$0xff] }
 0x258   :  { %2750 = vmatprep.mubr.f32.mxu1 %v1937_v8 }
 0x25b   :  { %2751 = vmatmul.mubr.f32.gmra.mrb[94].mxu1 %v1936_v33 }
 0x25c   :  { %2755 = vmatprep.mubr.f32.mxu1 %v1939_v1  ;;  %v2045_v1 = vpop.permute.xlu0 %2044 }
 0x25f   :  { %2756 = vmatmul.mubr.f32.gmra.mrb[96].mxu1 %v1938_v14 }
 0x260   :  { %2760 = vmatprep.mubr.f32.mxu1 %v1941_v21 }
 0x263   :  { %2761 = vmatmul.mubr.f32.gmra.mrb[98].mxu1 %v1940_v32  ;;  %v1963_v32 = vld [vmem:[%s5536_s7 + $0x1c8] sm:$0xff] }
 0x264   :  { %2765 = vmatprep.mubr.f32.mxu1 %v1943_v16  ;;  %v2050_v16 = vpop.permute.xlu1 %2049 }
 0x267   :  { %2766 = vmatmul.mubr.f32.gmra.mrb[100].mxu1 %v1942_v46 }
 0x268   :  { %2770 = vmatprep.mubr.f32.mxu1 %v1945_v17 }
 0x26b   :  { %2771 = vmatmul.mubr.f32.gmra.mrb[102].mxu1 %v1944_v23 }
 0x26c   :  { %2775 = vmatprep.mubr.f32.mxu1 %v1947_v18  ;;  %v1965_v18 = vld [vmem:[%s5536_s7 + $0x1d8] sm:$0xff] }
 0x26f   :  { %2776 = vmatmul.mubr.f32.gmra.mrb[104].mxu1 %v1946_v25  ;;  %v5370_v25 = vpop.permute.xlu0 %2134 }
 0x270   :  { %2780 = vmatprep.mubr.f32.mxu1 %v1949_v57 }
 0x272   :  { %v2228_v31 = vpop.f32.mrb[0].mxu1 }
 0x273   :  { %v2230_v42 = vpop.f32.mrb[1].mxu1  ;;  %2781 = vmatmul.mubr.f32.gmra.mrb[106].mxu1 %v1948_v45  ;;  %v2229_v34 = vadd.f32 %v2228_v31, %v2005_v5 }
 0x274   :  { %2785 = vmatprep.mubr.f32.mxu1 %v1951_v58  ;;  %v5372_v58 = vpop.permute.xlu1 %2139 }
 0x275   :  { %v2387_v40 = vmax.f32 %v2229_v34, 0.0 }
 0x276   :  { %v2233_v37 = vpop.f32.mrb[2].mxu1 }
 0x277   :  { %v2234_v61 = vadd.f32 %v2233_v37, %v2010_v9  ;;  %v2235_v38 = vpop.f32.mrb[3].mxu1  ;;  %2786 = vmatmul.mubr.f32.gmra.mrb[108].mxu1 %v1950_v56  ;;  %v1960_v9 = vld [vmem:[%s5536_s7 + $0x1b0] sm:$0xff]  ;;  %v1967_v56 = vld [vmem:[%s5536_s7 + $0x1e8] sm:$0xff] }
 0x278   :  { %2790 = vmatprep.mubr.f32.mxu1 %v1953_v29  ;;  %v1966_v38 = vld [vmem:[%s5536_s7 + $0x1e0] sm:$0xff] }
 0x279   :  { %v2388_v27 = vmax.f32 %v2234_v61, 0.0  ;;  %v2055_v61 = vpop.permute.xlu0 %2054 }
 0x27a   :  { %v2238_v30 = vpop.f32.mrb[4].mxu1 }
 0x27b   :  { %v5330_v2 = vpack.c.bf16 %v2388_v27, %v2387_v40  ;;  %v2240_v43 = vpop.f32.mrb[5].mxu1  ;;  %2791 = vmatmul.mubr.f32.gmra.mrb[110].mxu1 %v1952_v39  ;;  %v2239_v3 = vadd.f32 %v2238_v30, %v2015_v36  ;;  %v1969_v40 = vld [vmem:[%s5536_s7 + $0x1f8] sm:$0xff]  ;;  %v2060_v27 = vpop.permute.xlu1 %2059 }
 0x27c   :  { %2795 = vmatprep.mubr.f32.mxu1 %v1955_v4 }
 0x27d   :  { %v2389_v55 = vmax.f32 %v2239_v3, 0.0 }
 0x27e   :  { %v2243_v48 = vpop.f32.mrb[6].mxu1 }
 0x27f   :  { %v2244_v53 = vadd.f32 %v2243_v48, %v2020_v22  ;;  %v2245_v13 = vpop.f32.mrb[7].mxu1  ;;  %2796 = vmatmul.mubr.f32.gmra.mrb[112].mxu1 %v1954_v47  ;;  %v1962_v22 = vld [vmem:[%s5536_s7 + $0x1c0] sm:$0xff] }
 0x280   :  { %2800 = vmatprep.mubr.f32.mxu1 %v1957_v52  ;;  %v5391_v52 = vpop.permute.xlu0 %2144  ;;  %v5395_v13 = vpop.permute.xlu1 %2149 }
 0x281   :  { %v2390_v59 = vmax.f32 %v2244_v53, 0.0 }
 0x282   :  { %v2248_v49 = vpop.f32.mrb[8].mxu1 }
 0x283   :  { %v5346_v60 = vpack.c.bf16 %v2390_v59, %v2389_v55  ;;  %v2250_v24 = vpop.f32.mrb[9].mxu1  ;;  %2801 = vmatmul.mubr.f32.gmra.mrb[114].mxu1 %v1956_v12  ;;  %v2249_v20 = vadd.f32 %v2248_v49, %v2025_v28 }
 0x284   :  { %2805 = vmatprep.mubr.f32.mxu1 %v1959_v10  ;;  %v2065_v49 = vpop.permute.xlu0 %2064 }
 0x285   :  { %v2391_v14 = vmax.f32 %v2249_v20, 0.0  ;;  %v2070_v20 = vpop.permute.xlu1 %2069 }
 0x286   :  { %v2253_v8 = vpop.f32.mrb[10].mxu1 }
 0x287   :  { %v2254_v5 = vadd.f32 %v2253_v8, %v2030_v51  ;;  %v2255_v33 = vpop.f32.mrb[11].mxu1  ;;  %2806 = vmatmul.mubr.f32.gmra.mrb[116].mxu1 %v1958_v50  ;;  %v1964_v51 = vld [vmem:[%s5536_s7 + $0x1d0] sm:$0xff] }
 0x288   :  { %2810 = vmatprep.mubr.f32.mxu1 %v1961_v19 }
 0x289   :  { %v2392_v21 = vmax.f32 %v2254_v5, 0.0 }
 0x28a   :  { %v2258_v36 = vpop.f32.mrb[12].mxu1 }
 0x28b   :  { %v5362_v46 = vpack.c.bf16 %v2392_v21, %v2391_v14  ;;  %v2260_v17 = vpop.f32.mrb[13].mxu1  ;;  %2811 = vmatmul.mubr.f32.gmra.mrb[118].mxu1 %v1960_v9  ;;  %v2259_v23 = vadd.f32 %v2258_v36, %v2035_v44  ;;  %v1968_v44 = vld [vmem:[%s5536_s7 + $0x1f0] sm:$0xff] }
 0x28c   :  { %2815 = vmatprep.mubr.f32.mxu1 %v1963_v32  ;;  %v5401_v32 = vpop.permute.xlu1 %2159 }
 0x28d   :  { %v2393_v31 = vmax.f32 %v2259_v23, 0.0 }
 0x28e   :  { %v2263_v57 = vpop.f32.mrb[14].mxu1 }
 0x28f   :  { %v2264_v28 = vadd.f32 %v2263_v57, %v2040_v62  ;;  %v2265_v45 = vpop.f32.mrb[15].mxu1  ;;  %2816 = vmatmul.mubr.f32.gmra.mrb[120].mxu1 %v1962_v22 }
 0x290   :  { %2820 = vmatprep.mubr.f32.mxu1 %v1965_v18 }
 0x291   :  { %v2394_v42 = vmax.f32 %v2264_v28, 0.0  ;;  %v2080_v28 = vpop.permute.xlu1 %2079 }
 0x292   :  { %v2268_v34 = vpop.f32.mrb[16].mxu1 }
 0x293   :  { %v5380_v29 = vpack.c.bf16 %v2394_v42, %v2393_v31  ;;  %v2270_v37 = vpop.f32.mrb[17].mxu1  ;;  %2821 = vmatmul.mubr.f32.gmra.mrb[122].mxu1 %v1964_v51  ;;  %v2269_v39 = vadd.f32 %v2268_v34, %v2045_v1  ;;  %v5399_v1 = vpop.permute.xlu0 %2154 }
 0x294   :  { %2825 = vmatprep.mubr.f32.mxu1 %v1967_v56 }
 0x295   :  { %v2395_v47 = vmax.f32 %v2269_v39, 0.0  ;;  %v2870_v39 = vlaneseq }
 0x296   :  { %v2273_v4 = vpop.f32.mrb[18].mxu1 }
 0x297   :  { %v2274_v30 = vadd.f32 %v2273_v4, %v2050_v16  ;;  %v2275_v43 = vpop.f32.mrb[19].mxu1  ;;  %2826 = vmatmul.mubr.f32.gmra.mrb[124].mxu1 %v1966_v38  ;;  %v2075_v18 = vpop.permute.xlu0 %2074 }
 0x298   :  { %2830 = vmatprep.mubr.f32.mxu1 %v1969_v40 }
 0x299   :  { %v2396_v3 = vmax.f32 %v2274_v30, 0.0  ;;  %v5409_v30 = vshrl.u32 %v2870_v39, 7 }
 0x29a   :  { %v2278_v62 = vpop.f32.mrb[20].mxu1 }
 0x29b   :  { %v5393_v48 = vpack.c.bf16 %v2396_v3, %v2395_v47  ;;  %v2280_v53 = vpop.f32.mrb[21].mxu1  ;;  %2831 = vmatmul.mubr.f32.gmra.mrb[126].mxu1 %v1968_v44  ;;  %v2279_v12 = vadd.f32 %v2278_v62, %v2055_v61  ;;  %v2876_v47 = vsub.s32 1, %v5409_v30  ;;  %v5415_v62 = vld [vmem:[%s5537_s9] sm:$0x3] }
 0x29d   :  { %v2397_v24 = vmax.f32 %v2279_v12, 0.0 }
 0x29e   :  { %v2283_v55 = vpop.f32.mrb[22].mxu1 }
 0x29f   :  { %v2284_v59 = vadd.f32 %v2283_v55, %v2060_v27  ;;  %v2285_v10 = vpop.f32.mrb[23].mxu1 }
 0x2a1   :  { %v2398_v50 = vmax.f32 %v2284_v59, 0.0 }
 0x2a2   :  { %v2288_v19 = vpop.f32.mrb[24].mxu1 }
 0x2a3   :  { %v5397_v8 = vpack.c.bf16 %v2398_v50, %v2397_v24  ;;  %v2290_v5 = vpop.f32.mrb[25].mxu1  ;;  %v2289_v33 = vadd.f32 %v2288_v19, %v2065_v49 }
 0x2a5   :  { %v2399_v16 = vmax.f32 %v2289_v33, 0.0 }
 0x2a6   :  { %v2293_v9 = vpop.f32.mrb[26].mxu1 }
 0x2a7   :  { %v2294_v14 = vadd.f32 %v2293_v9, %v2070_v20  ;;  %v2295_v21 = vpop.f32.mrb[27].mxu1 }
 0x2a9   :  { %v2400_v36 = vmax.f32 %v2294_v14, 0.0 }
 0x2aa   :  { %v2298_v17 = vpop.f32.mrb[28].mxu1 }
 0x2ab   :  { %v5403_v22 = vpack.c.bf16 %v2400_v36, %v2399_v16  ;;  %v2300_v23 = vpop.f32.mrb[29].mxu1  ;;  %v2299_v57 = vadd.f32 %v2298_v17, %v2075_v18 }
 0x2ad   :  { %v2401_v42 = vmax.f32 %v2299_v57, 0.0 }
 0x2ae   :  { %v2303_v45 = vpop.f32.mrb[30].mxu1 }
 0x2af   :  { %v2304_v51 = vadd.f32 %v2303_v45, %v2080_v28  ;;  %v2305_v31 = vpop.f32.mrb[31].mxu1 }
 0x2b1   :  { %v2402_v56 = vmax.f32 %v2304_v51, 0.0  ;;  %v5431_v51 = vpop.permute.xlu1 %2538 }
 0x2b2   :  { %v2308_v34 = vpop.f32.mrb[32].mxu1 }
 0x2b3   :  { %v5405_v37 = vpack.c.bf16 %v2402_v56, %v2401_v42  ;;  %v2310_v61 = vpop.f32.mrb[33].mxu1  ;;  %v2309_v38 = vadd.f32 %v2308_v34, %v5254_v6  ;;  %v2877_v6 = vrot.slane %v5415_v62, %v2876_v47 }
 0x2b5   :  { %v2403_v43 = vmax.f32 %v2309_v38, 0.0  ;;  %2944 = vmatprep.mubr.f32.mxu0 %v2877_v6  ;;  %v2459_v61 = vpop.permute.xlu1 %2458 }
 0x2b6   :  { %v2313_v40 = vpop.f32.mrb[34].mxu1 }
 0x2b7   :  { %v2314_v27 = vadd.f32 %v2313_v40, %v5256_v7  ;;  %v2315_v4 = vpop.f32.mrb[35].mxu1 }
 0x2b9   :  { %v2404_v44 = vmax.f32 %v2314_v27, 0.0 }
 0x2ba   :  { %v2318_v3 = vpop.f32.mrb[36].mxu1 }
 0x2bb   :  { %v3686_v53 = vpack.c.bf16 %v2404_v44, %v2403_v43  ;;  %v2320_v12 = vpop.f32.mrb[37].mxu1  ;;  %v2319_v7 = vadd.f32 %v2318_v3, %v5276_v15 }
 0x2bd   :  { %3687 = vmatprep.subr.bf16.mxu0 %v3686_v53  ;;  %v2405_v49 = vmax.f32 %v2319_v7, 0.0 }
 0x2be   :  { %v2323_v55 = vpop.f32.mrb[38].mxu1  ;;  %3689 = vmatpush3.bf16.msra.mxu0 %v5330_v2 }
 0x2bf   :  { %v2324_v59 = vadd.f32 %v2323_v55, %v5278_v26  ;;  %v2325_v10 = vpop.f32.mrb[39].mxu1 }
 0x2c1   :  { %v2406_v24 = vmax.f32 %v2324_v59, 0.0 }
 0x2c2   :  { %v2328_v50 = vpop.f32.mrb[40].mxu1 }
 0x2c3   :  { %v3690_v20 = vpack.c.bf16 %v2406_v24, %v2405_v49  ;;  %v2330_v19 = vpop.f32.mrb[41].mxu1  ;;  %v2329_v5 = vadd.f32 %v2328_v50, %v5298_v35 }
 0x2c5   :  { %3691 = vmatprep.subr.bf16.mxu0 %v3690_v20  ;;  %v2407_v14 = vmax.f32 %v2329_v5, 0.0 }
 0x2c6   :  { %v2333_v33 = vpop.f32.mrb[42].mxu1  ;;  %3693 = vmatpush3.bf16.msra.mxu0 %v5346_v60  ;;  %v5429_v60 = vpop.permute.xlu0 %2533 }
 0x2c7   :  { %v2334_v15 = vadd.f32 %v2333_v33, %v5300_v41  ;;  %v2335_v9 = vpop.f32.mrb[43].mxu1 }
 0x2c9   :  { %v2408_v21 = vmax.f32 %v2334_v15, 0.0 }
 0x2ca   :  { %v2338_v2 = vpop.f32.mrb[44].mxu1 }
 0x2cb   :  { %v3694_v16 = vpack.c.bf16 %v2408_v21, %v2407_v14  ;;  %v2340_v26 = vpop.f32.mrb[45].mxu1  ;;  %v2339_v36 = vadd.f32 %v2338_v2, %v5320_v54  ;;  %v2872_v21 = vsub.s32 0, %v5409_v30 }
 0x2cd   :  { %3695 = vmatprep.subr.bf16.mxu0 %v3694_v16  ;;  %v2409_v18 = vmax.f32 %v2339_v36, 0.0 }
 0x2ce   :  { %v2343_v17 = vpop.f32.mrb[46].mxu1  ;;  %3697 = vmatpush3.bf16.msra.mxu0 %v5362_v46 }
 0x2cf   :  { %v2344_v35 = vadd.f32 %v2343_v17, %v5322_v63  ;;  %v2345_v23 = vpop.f32.mrb[47].mxu1  ;;  %v2454_v63 = vpop.permute.xlu0 %2453 }
 0x2d1   :  { %v2410_v57 = vmax.f32 %v2344_v35, 0.0 }
 0x2d2   :  { %v2348_v41 = vpop.f32.mrb[48].mxu1 }
 0x2d3   :  { %v3698_v28 = vpack.c.bf16 %v2410_v57, %v2409_v18  ;;  %v2350_v45 = vpop.f32.mrb[49].mxu1  ;;  %v2349_v31 = vadd.f32 %v2348_v41, %v5344_v11  ;;  %v5437_v4 = vpop.permute.xlu0 %2543 }
 0x2d5   :  { %3699 = vmatprep.subr.bf16.mxu0 %v3698_v28  ;;  %v2411_v56 = vmax.f32 %v2349_v31, 0.0 }
 0x2d6   :  { %v2353_v54 = vpop.f32.mrb[50].mxu1  ;;  %3701 = vmatpush3.bf16.msra.mxu0 %v5380_v29 }
 0x2d7   :  { %v2354_v46 = vadd.f32 %v2353_v54, %v5348_v0  ;;  %v2355_v42 = vpop.f32.mrb[51].mxu1  ;;  %v5441_v0 = vpop.permute.xlu1 %2548 }
 0x2d8   :  { %v2464_v7 = vpop.permute.xlu0 %2463 }
 0x2d9   :  { %v2412_v34 = vmax.f32 %v2354_v46, 0.0 }
 0x2da   :  { %v2358_v38 = vpop.f32.mrb[52].mxu1 }
 0x2db   :  { %v3702_v39 = vpack.c.bf16 %v2412_v34, %v2411_v56  ;;  %v2360_v40 = vpop.f32.mrb[53].mxu1  ;;  %v2359_v27 = vadd.f32 %v2358_v38, %v5370_v25  ;;  %v2469_v25 = vpop.permute.xlu1 %2468 }
 0x2dc   :  { %v5446_v24 = vpop.permute.xlu0 %2553 }
 0x2dd   :  { %3703 = vmatprep.subr.bf16.mxu0 %v3702_v39  ;;  %v2413_v44 = vmax.f32 %v2359_v27, 0.0 }
 0x2de   :  { %v2363_v11 = vpop.f32.mrb[54].mxu1  ;;  %3705 = vmatpush3.bf16.msra.mxu0 %v5393_v48 }
 0x2df   :  { %v2364_v29 = vadd.f32 %v2363_v11, %v5372_v58  ;;  %v2365_v43 = vpop.f32.mrb[55].mxu1  ;;  %v5448_v5 = vpop.permute.xlu1 %2558 }
 0x2e1   :  { %v2414_v3 = vmax.f32 %v2364_v29, 0.0 }
 0x2e2   :  { %v2368_v53 = vpop.f32.mrb[56].mxu1 }
 0x2e3   :  { %v3706_v12 = vpack.c.bf16 %v2414_v3, %v2413_v44  ;;  %v2370_v6 = vpop.f32.mrb[57].mxu1  ;;  %v2369_v55 = vadd.f32 %v2368_v53, %v5391_v52  ;;  %v2479_v2 = vpop.permute.xlu1 %2478 }
 0x2e5   :  { %3707 = vmatprep.subr.bf16.mxu0 %v3706_v12  ;;  %v2415_v58 = vmax.f32 %v2369_v55, 0.0 }
 0x2e6   :  { %v2373_v59 = vpop.f32.mrb[58].mxu1  ;;  %3709 = vmatpush3.bf16.msra.mxu0 %v5397_v8 }
 0x2e7   :  { %v2374_v48 = vadd.f32 %v2373_v59, %v5395_v13  ;;  %v2375_v10 = vpop.f32.mrb[59].mxu1  ;;  %v2474_v13 = vpop.permute.xlu0 %2473 }
 0x2e8   :  { %v5465_v28 = vpop.permute.xlu1 %2568 }
 0x2e9   :  { %v2416_v49 = vmax.f32 %v2374_v48, 0.0 }
 0x2ea   :  { %v2378_v50 = vpop.f32.mrb[60].mxu1 }
 0x2eb   :  { %v3710_v20 = vpack.c.bf16 %v2416_v49, %v2415_v58  ;;  %v2380_v19 = vpop.f32.mrb[61].mxu1  ;;  %v2379_v33 = vadd.f32 %v2378_v50, %v5399_v1  ;;  %v2873_v1 = vrot.slane %v5415_v62, %v2872_v21  ;;  %v5458_v35 = vpop.permute.xlu0 %2563 }
 0x2ed   :  { %3711 = vmatprep.subr.bf16.mxu0 %v3710_v20  ;;  %v2417_v9 = vmax.f32 %v2379_v33, 0.0 }
 0x2ee   :  { %v2383_v52 = vpop.f32.mrb[62].mxu1  ;;  %3713 = vmatpush3.bf16.msra.mxu0 %v5403_v22  ;;  %v2950_v22 = vld [vmem:[%s5538_s10] sm:$0x3] }
 0x2ef   :  { %v2384_v8 = vadd.f32 %v2383_v52, %v5401_v32  ;;  %v2385_v15 = vpop.f32.mrb[63].mxu1  ;;  %v5461_v23 = vrot.slane %v2950_v22, %v2872_v21  ;;  %v2959_v18 = vrot.slane %v2950_v22, %v2876_v47  ;;  %v2484_v42 = vpop.permute.xlu0 %2483 }
 0x2f1   :  { %v2418_v14 = vmax.f32 %v2384_v8, 0.0 }
 0x2f2   :  { %v2677_v16 = vpop.f32.mrb[64].mxu1 }
 0x2f3   :  { %v3714_v26 = vpack.c.bf16 %v2418_v14, %v2417_v9  ;;  %v2679_v36 = vpop.f32.mrb[65].mxu1  ;;  %v2678_v17 = vadd.f32 %v2677_v16, %v2454_v63 }
 0x2f5   :  { %3715 = vmatprep.subr.bf16.mxu0 %v3714_v26  ;;  %v2836_v45 = vmax.f32 %v2678_v17, 0.0 }
 0x2f6   :  { %v2682_v32 = vpop.f32.mrb[66].mxu1  ;;  %3717 = vmatpush3.bf16.msra.mxu0 %v5405_v37  ;;  %v2489_v37 = vpop.permute.xlu1 %2488 }
 0x2f7   :  { %v2683_v57 = vadd.f32 %v2682_v32, %v2459_v61  ;;  %v2684_v41 = vpop.f32.mrb[67].mxu1  ;;  %v5469_v61 = vpop.permute.xlu0 %2573 }
 0x2f9   :  { %v2837_v62 = vmax.f32 %v2683_v57, 0.0  ;;  %2945 = vmatmul.mubr.f32.vlgmr.msra.gmra.mrb[64].mxu0 %v2873_v1 }
 0x2fa   :  { %v2687_v31 = vpop.f32.mrb[68].mxu1  ;;  %3026 = vmatprep.mubr.f32.mxu0 %v2959_v18  ;;  %v5473_v11 = vpop.permute.xlu1 %2578 }
 0x2fb   :  { %v5467_v54 = vpack.c.bf16 %v2837_v62, %v2836_v45  ;;  %v2689_v46 = vpop.f32.mrb[69].mxu1  ;;  %v2688_v63 = vadd.f32 %v2687_v31, %v2464_v7  ;;  %v2494_v53 = vpop.permute.xlu0 %2493 }
 0x2fd   :  { %v2838_v30 = vmax.f32 %v2688_v63, 0.0 }
 0x2fe   :  { %v2692_v56 = vpop.f32.mrb[70].mxu1  ;;  %v2499_v7 = vpop.permute.xlu1 %2498 }
 0x2ff   :  { %v2693_v34 = vadd.f32 %v2692_v56, %v2469_v25  ;;  %v2694_v38 = vpop.f32.mrb[71].mxu1  ;;  %v5477_v10 = vpop.permute.xlu0 %2583 }
 0x301   :  { %v2839_v47 = vmax.f32 %v2693_v34, 0.0 }
 0x302   :  { %v2697_v39 = vpop.f32.mrb[72].mxu1  ;;  %v5479_v20 = vpop.permute.xlu1 %2588 }
 0x303   :  { %v5471_v40 = vpack.c.bf16 %v2839_v47, %v2838_v30  ;;  %v2699_v27 = vpop.f32.mrb[73].mxu1  ;;  %v2698_v29 = vadd.f32 %v2697_v39, %v2474_v13  ;;  %v2504_v13 = vpop.permute.xlu0 %2503 }
 0x305   :  { %v2840_v12 = vmax.f32 %v2698_v29, 0.0 }
 0x306   :  { %v2702_v43 = vpop.f32.mrb[74].mxu1  ;;  %v2509_v14 = vpop.permute.xlu1 %2508 }
 0x307   :  { %v2703_v44 = vadd.f32 %v2702_v43, %v2479_v2  ;;  %v2704_v3 = vpop.f32.mrb[75].mxu1  ;;  %v5483_v17 = vpop.permute.xlu0 %2593 }
 0x309   :  { %v2841_v6 = vmax.f32 %v2703_v44, 0.0 }
 0x30a   :  { %v2707_v55 = vpop.f32.mrb[76].mxu1  ;;  %v5487_v18 = vpop.permute.xlu1 %2598 }
 0x30b   :  { %v5475_v25 = vpack.c.bf16 %v2841_v6, %v2840_v12  ;;  %v2709_v59 = vpop.f32.mrb[77].mxu1  ;;  %v2708_v48 = vadd.f32 %v2707_v55, %v2484_v42  ;;  %v2514_v31 = vpop.permute.xlu0 %2513 }
 0x30d   :  { %v2842_v19 = vmax.f32 %v2708_v48, 0.0 }
 0x30e   :  { %v2712_v58 = vpop.f32.mrb[78].mxu1  ;;  %v2519_v63 = vpop.permute.xlu1 %2518 }
 0x30f   :  { %v2713_v49 = vadd.f32 %v2712_v58, %v2489_v37  ;;  %v2714_v50 = vpop.f32.mrb[79].mxu1  ;;  %v5491_v30 = vpop.permute.xlu0 %2603 }
 0x311   :  { %v2843_v33 = vmax.f32 %v2713_v49, 0.0 }
 0x312   :  { %v2717_v52 = vpop.f32.mrb[80].mxu1  ;;  %v5493_v29 = vpop.permute.xlu1 %2608 }
 0x313   :  { %v5481_v8 = vpack.c.bf16 %v2843_v33, %v2842_v19  ;;  %v2719_v15 = vpop.f32.mrb[81].mxu1  ;;  %v2718_v9 = vadd.f32 %v2717_v52, %v2494_v53  ;;  %v2524_v6 = vpop.permute.xlu0 %2523 }
 0x315   :  { %v2844_v26 = vmax.f32 %v2718_v9, 0.0 }
 0x316   :  { %v2722_v21 = vpop.f32.mrb[82].mxu1  ;;  %v2529_v55 = vpop.permute.xlu1 %2528 }
 0x317   :  { %v2723_v2 = vadd.f32 %v2722_v21, %v2499_v7  ;;  %v2724_v16 = vpop.f32.mrb[83].mxu1 }
 0x319   :  { %v2845_v36 = vmax.f32 %v2723_v2, 0.0 }
 0x31a   :  { %v2727_v1 = vpop.f32.mrb[84].mxu1 }
 0x31b   :  { %v5485_v22 = vpack.c.bf16 %v2845_v36, %v2844_v26  ;;  %v2729_v32 = vpop.f32.mrb[85].mxu1  ;;  %v2728_v57 = vadd.f32 %v2727_v1, %v2504_v13 }
 0x31d   :  { %v2846_v46 = vmax.f32 %v2728_v57, 0.0 }
 0x31e   :  { %v2732_v41 = vpop.f32.mrb[86].mxu1 }
 0x31f   :  { %v2733_v45 = vadd.f32 %v2732_v41, %v2509_v14  ;;  %v2734_v62 = vpop.f32.mrb[87].mxu1 }
 0x321   :  { %v2847_v42 = vmax.f32 %v2733_v45, 0.0 }
 0x322   :  { %v2737_v37 = vpop.f32.mrb[88].mxu1 }
 0x323   :  { %v5489_v56 = vpack.c.bf16 %v2847_v42, %v2846_v46  ;;  %v2739_v34 = vpop.f32.mrb[89].mxu1  ;;  %v2738_v38 = vadd.f32 %v2737_v37, %v2514_v31 }
 0x325   :  { %v2848_v43 = vmax.f32 %v2738_v38, 0.0 }
 0x326   :  { %v2742_v47 = vpop.f32.mrb[90].mxu1 }
 0x327   :  { %v2743_v39 = vadd.f32 %v2742_v47, %v2519_v63  ;;  %v2744_v27 = vpop.f32.mrb[91].mxu1 }
 0x329   :  { %v2849_v44 = vmax.f32 %v2743_v39, 0.0 }
 0x32a   :  { %v2747_v3 = vpop.f32.mrb[92].mxu1 }
 0x32b   :  { %v5495_v53 = vpack.c.bf16 %v2849_v44, %v2848_v43  ;;  %v2749_v12 = vpop.f32.mrb[93].mxu1  ;;  %v2748_v7 = vadd.f32 %v2747_v3, %v2524_v6 }
 0x32d   :  { %v2850_v49 = vmax.f32 %v2748_v7, 0.0 }
 0x32e   :  { %v2752_v59 = vpop.f32.mrb[94].mxu1 }
 0x32f   :  { %v2753_v48 = vadd.f32 %v2752_v59, %v2529_v55  ;;  %v2754_v58 = vpop.f32.mrb[95].mxu1 }
 0x331   :  { %v2851_v50 = vmax.f32 %v2753_v48, 0.0 }
 0x332   :  { %v2757_v19 = vpop.f32.mrb[96].mxu1 }
 0x333   :  { %v5497_v33 = vpack.c.bf16 %v2851_v50, %v2850_v49  ;;  %v2759_v52 = vpop.f32.mrb[97].mxu1  ;;  %v2758_v15 = vadd.f32 %v2757_v19, %v5429_v60 }
 0x335   :  { %v2852_v21 = vmax.f32 %v2758_v15, 0.0 }
 0x336   :  { %v2762_v13 = vpop.f32.mrb[98].mxu1 }
 0x337   :  { %v2763_v9 = vadd.f32 %v2762_v13, %v5431_v51  ;;  %v2764_v14 = vpop.f32.mrb[99].mxu1 }
 0x339   :  { %v2853_v2 = vmax.f32 %v2763_v9, 0.0 }
 0x33a   :  { %v2767_v16 = vpop.f32.mrb[100].mxu1 }
 0x33b   :  { %v3718_v26 = vpack.c.bf16 %v2853_v2, %v2852_v21  ;;  %v2769_v36 = vpop.f32.mrb[101].mxu1  ;;  %v2768_v1 = vadd.f32 %v2767_v16, %v5437_v4 }
 0x33d   :  { %3719 = vmatprep.subr.bf16.mxu0 %v3718_v26  ;;  %v2854_v45 = vmax.f32 %v2768_v1, 0.0 }
 0x33e   :  { %v2772_v32 = vpop.f32.mrb[102].mxu1  ;;  %3721 = vmatpush3.bf16.msra.mxu0 %v5467_v54 }
 0x33f   :  { %v2773_v57 = vadd.f32 %v2772_v32, %v5441_v0  ;;  %v2774_v41 = vpop.f32.mrb[103].mxu1 }
 0x341   :  { %v2855_v60 = vmax.f32 %v2773_v57, 0.0 }
 0x342   :  { %v2777_v62 = vpop.f32.mrb[104].mxu1 }
 0x343   :  { %v3722_v31 = vpack.c.bf16 %v2855_v60, %v2854_v45  ;;  %v2779_v51 = vpop.f32.mrb[105].mxu1  ;;  %v2778_v46 = vadd.f32 %v2777_v62, %v5446_v24 }
 0x345   :  { %3723 = vmatprep.subr.bf16.mxu0 %v3722_v31  ;;  %v2856_v37 = vmax.f32 %v2778_v46, 0.0 }
 0x346   :  { %v2782_v42 = vpop.f32.mrb[106].mxu1  ;;  %3725 = vmatpush3.bf16.msra.mxu0 %v5471_v40 }
 0x347   :  { %v2783_v4 = vadd.f32 %v2782_v42, %v5448_v5  ;;  %v2784_v63 = vpop.f32.mrb[107].mxu1 }
 0x349   :  { %v2857_v34 = vmax.f32 %v2783_v4, 0.0 }
 0x34a   :  { %v2787_v54 = vpop.f32.mrb[108].mxu1 }
 0x34b   :  { %v3726_v38 = vpack.c.bf16 %v2857_v34, %v2856_v37  ;;  %v2789_v0 = vpop.f32.mrb[109].mxu1  ;;  %v2788_v47 = vadd.f32 %v2787_v54, %v5458_v35 }
 0x34d   :  { %3727 = vmatprep.subr.bf16.mxu0 %v3726_v38  ;;  %v2858_v43 = vmax.f32 %v2788_v47, 0.0 }
 0x34e   :  { %v2792_v39 = vpop.f32.mrb[110].mxu1  ;;  %3729 = vmatpush3.bf16.msra.mxu0 %v5475_v25 }
 0x34f   :  { %v2793_v24 = vadd.f32 %v2792_v39, %v5465_v28  ;;  %v2794_v27 = vpop.f32.mrb[111].mxu1 }
 0x351   :  { %v2859_v44 = vmax.f32 %v2793_v24, 0.0 }
 0x352   :  { %v2797_v40 = vpop.f32.mrb[112].mxu1 }
 0x353   :  { %v3730_v3 = vpack.c.bf16 %v2859_v44, %v2858_v43  ;;  %v2799_v5 = vpop.f32.mrb[113].mxu1  ;;  %v2798_v12 = vadd.f32 %v2797_v40, %v5469_v61 }
 0x355   :  { %3731 = vmatprep.subr.bf16.mxu0 %v3730_v3  ;;  %v2860_v55 = vmax.f32 %v2798_v12, 0.0 }
 0x356   :  { %v2802_v6 = vpop.f32.mrb[114].mxu1  ;;  %3733 = vmatpush3.bf16.msra.mxu0 %v5481_v8 }
 0x357   :  { %v2803_v35 = vadd.f32 %v2802_v6, %v5473_v11  ;;  %v2804_v7 = vpop.f32.mrb[115].mxu1 }
 0x359   :  { %v2861_v59 = vmax.f32 %v2803_v35, 0.0 }
 0x35a   :  { %v2807_v25 = vpop.f32.mrb[116].mxu1 }
 0x35b   :  { %v3734_v48 = vpack.c.bf16 %v2861_v59, %v2860_v55  ;;  %v2809_v28 = vpop.f32.mrb[117].mxu1  ;;  %v2808_v58 = vadd.f32 %v2807_v25, %v5477_v10 }
 0x35d   :  { %3735 = vmatprep.subr.bf16.mxu0 %v3734_v48  ;;  %v2862_v19 = vmax.f32 %v2808_v58, 0.0 }
 0x35e   :  { %v2812_v49 = vpop.f32.mrb[118].mxu1  ;;  %3737 = vmatpush3.bf16.msra.mxu0 %v5485_v22 }
 0x35f   :  { %v2813_v61 = vadd.f32 %v2812_v49, %v5479_v20  ;;  %v2814_v50 = vpop.f32.mrb[119].mxu1 }
 0x361   :  { %v2863_v52 = vmax.f32 %v2813_v61, 0.0 }
 0x362   :  { %v2817_v8 = vpop.f32.mrb[120].mxu1 }
 0x363   :  { %v3738_v15 = vpack.c.bf16 %v2863_v52, %v2862_v19  ;;  %v2819_v11 = vpop.f32.mrb[121].mxu1  ;;  %v2818_v13 = vadd.f32 %v2817_v8, %v5483_v17 }
 0x365   :  { %3739 = vmatprep.subr.bf16.mxu0 %v3738_v15  ;;  %v2864_v21 = vmax.f32 %v2818_v13, 0.0 }
 0x366   :  { %v2822_v9 = vpop.f32.mrb[122].mxu1  ;;  %3741 = vmatpush3.bf16.msra.mxu0 %v5489_v56 }
 0x367   :  { %v2823_v10 = vadd.f32 %v2822_v9, %v5487_v18  ;;  %v2824_v14 = vpop.f32.mrb[123].mxu1 }
 0x369   :  { %v2865_v2 = vmax.f32 %v2823_v10, 0.0 }
 0x36a   :  { %v2827_v22 = vpop.f32.mrb[124].mxu1 }
 0x36b   :  { %v3742_v16 = vpack.c.bf16 %v2865_v2, %v2864_v21  ;;  %v2829_v20 = vpop.f32.mrb[125].mxu1  ;;  %v2828_v26 = vadd.f32 %v2827_v22, %v5491_v30 }
 0x36d   :  { %3743 = vmatprep.subr.bf16.mxu0 %v3742_v16  ;;  %v2866_v32 = vmax.f32 %v2828_v26, 0.0 }
 0x36e   :  { %v2832_v36 = vpop.f32.mrb[126].mxu1  ;;  %3745 = vmatpush3.bf16.msra.mxu0 %v5495_v53  ;;  %v3041_v53 = vpop.permute.xlu0 %3040 }
 0x36f   :  { %v2833_v17 = vadd.f32 %v2832_v36, %v5493_v29  ;;  %v2834_v1 = vpop.f32.mrb[127].mxu1 }
 0x371   :  { %v2867_v57 = vmax.f32 %v2833_v17, 0.0 }
 0x373   :  { %v3746_v56 = vpack.c.bf16 %v2867_v57, %v2866_v32 }
 0x375   :  { %3747 = vmatprep.subr.bf16.mxu0 %v3746_v56 }
 0x376   :  { %3749 = vmatpush3.bf16.msra.mxu0 %v5497_v33 }
 0x379   :  { %3027 = vmatmul.mubr.f32.vlgmr.msra.gmra.mrb[66].mxu0 %v5461_v23 }
 0x3cc   :  { %v3342_v18 = vpop.f32.mrb[64].mxu0 }
 0x3cd   :  { %v3343_v41 = vpop.f32.mrb[65].mxu0 }
 0x3ce   :  { %v3344_v45 = vadd.f32 %v3343_v41, %v3342_v18 }
 0x44c   :  { %v3377_v60 = vpop.f32.mrb[66].mxu0 }
 0x44d   :  { %v3378_v30 = vpop.f32.mrb[67].mxu0 }
 0x44e   :  { %v3379_v62 = vadd.f32 %v3378_v30, %v3377_v60 }
 0x450   :  { %v3033_v31 = vrot.slane %v3379_v62, 7 }
 0x452   :  { %v3036_v51 = vsel %vm3035_vm2, %v3344_v45, %v3033_v31 }
 0x453   :  { %v3043_v29 = vadd.f32 %v3041_v53, %v3036_v51 }
 0x455   :  { %3044 = vst [vmem:[%s5539_s12] sm:$0x3] %v3043_v29 }

</bundles_post_ra>
